<compile_context>
chip_gen: v7x
topology: tpu7x:2x2x1
jax: 0.10.0
libtpu: 0.0.40
codegen_flags: <defaults>
</compile_context>

<pallas_src>
import math
import functools

import jax
import jax.numpy as jnp
from jax.experimental import pallas as pl
from jax.experimental.pallas import tpu as pltpu


# ------------------------------- in-kernel helpers -------------------------------

def _layernorm(x, a, b, eps=1e-6):
    # x: (N, D); a, b: (1, D).  torch: a*(x-mean)/(std_unbiased + eps) + b
    mean = jnp.mean(x, axis=-1, keepdims=True)
    diff = x - mean
    var_unbiased = jnp.sum(diff * diff, axis=-1, keepdims=True) * (1.0 / (x.shape[-1] - 1))
    std = jnp.sqrt(var_unbiased)
    return a * diff / (std + eps) + b


def _softmax_lastdim(s):
    s = s - jnp.max(s, axis=-1, keepdims=True)
    p = jnp.exp(s)
    denom = jnp.sum(p, axis=-1, keepdims=True)
    return p * pl.reciprocal(denom, approx=True)


# ----------------------------------- kernel --------------------------------------

def transformer_kernel(x_ref, na_ref, nb_ref,
                       ln1a_ref, ln1b_ref, wqkv_ref, bqkv_ref, wo_ref, bo_ref,
                       ln2a_ref, ln2b_ref, w1_ref, b1_ref, w2_ref, b2_ref,
                       o_ref, *, n_block, n_head, batch, seq, d_model):
    d_k = d_model // n_head
    scale = 1.0 / math.sqrt(d_k)
    bs = batch * seq
    hb = n_head * batch

    x = x_ref[...]                                        # (B*S, D)
    x = _layernorm(x, na_ref[...], nb_ref[...])           # outer Transformer.norm

    for l in range(n_block):                              # static unroll over layers
        # --- sublayer 0: x + SelfAttn(LN(x)) ------------------------------------
        h = _layernorm(x, ln1a_ref[l], ln1b_ref[l])
        # fused QKV projection: one MXU push + one bias add
        qkv = jnp.dot(h, wqkv_ref[l], preferred_element_type=jnp.float32) + bqkv_ref[l]

        def split_heads(t):
            # (B*S, 3D) -> (n_head*B, S, d_k); head-major leading order (h*B + b).
            # Per-head lane slices + major-axis concat only (no lane concat).
            base = t * d_model
            parts = [
                qkv[:, base + hd * d_k: base + (hd + 1) * d_k].reshape(batch, seq, d_k)
                for hd in range(n_head)
            ]
            return jnp.concatenate(parts, axis=0)

        q = split_heads(0)                                # (H*B, S, d_k)
        k = split_heads(1)
        v = split_heads(2)

        # One batched contraction pair over all (head, batch) pairs.
        s = jnp.einsum('bqd,bkd->bqk', q, k,
                       preferred_element_type=jnp.float32) * scale   # (H*B, S, S)
        p = _softmax_lastdim(s)
        o = jnp.einsum('bqk,bkd->bqd', p, v,
                       preferred_element_type=jnp.float32)           # (H*B, S, d_k)

        # Output projection without a lane concat: head-blocked Wo (sublane split),
        # one batched einsum over heads, then a major-dim reduce.
        o3 = o.reshape(n_head, bs, d_k)                    # (H, B*S, d_k)
        wo3 = wo_ref[l].reshape(n_head, d_k, d_model)      # (H, d_k, D)
        attn = jnp.einsum('hnd,hdm->hnm', o3, wo3,
                          preferred_element_type=jnp.float32)        # (H, B*S, D)
        attn = jnp.sum(attn, axis=0) + bo_ref[l]           # (B*S, D)
        x = x + attn

        # --- sublayer 1: x + FFN(LN(x)) ------------------------------------------
        h2 = _layernorm(x, ln2a_ref[l], ln2b_ref[l])
        ff = jnp.maximum(
            jnp.dot(h2, w1_ref[l], preferred_element_type=jnp.float32) + b1_ref[l], 0.0)
        ff = jnp.dot(ff, w2_ref[l], preferred_element_type=jnp.float32) + b2_ref[l]
        x = x + ff

    o_ref[...] = x


# --------------------------------- wrapper ----------------------------------------

def transformer_forward(x, outer_ln, stacked, n_head):
    # x: (B, S, D).  One fused pallas_call for the full forward pass.
    B, S, D = x.shape
    n_block = stacked[0].shape[0]
    kernel = functools.partial(transformer_kernel, n_block=n_block, n_head=n_head,
                               batch=B, seq=S, d_model=D)
    n_inputs = 3 + len(stacked)
    vmem_spec = pl.BlockSpec(memory_space=pltpu.MemorySpace.VMEM)
    out = pl.pallas_call(
        kernel,
        out_shape=jax.ShapeDtypeStruct((B * S, D), x.dtype),
        in_specs=[vmem_spec] * n_inputs,
        out_specs=vmem_spec,
        input_output_aliases={0: 0},   # activation in == activation out buffer
    )(x.reshape(B * S, D), outer_ln[0], outer_ln[1], *stacked)
    return out.reshape(B, S, D)


# ----------------------------- parameter construction ----------------------------

_STACK_ORDER = ('ln1a', 'ln1b', 'wqkv', 'bqkv', 'wo', 'bo',
                'ln2a', 'ln2b', 'w1', 'b1', 'w2', 'b2')


def init_params(key, n_embs, dim_ff, n_block):
    def lin(key, fan_in, fan_out):
        kw, kb = jax.random.split(key)
        bound = 1.0 / math.sqrt(fan_in)
        # stored transposed to (in, out) so kernels do x @ W + b
        w = jax.random.uniform(kw, (fan_in, fan_out), jnp.float32, -bound, bound)
        b = jax.random.uniform(kb, (1, fan_out), jnp.float32, -bound, bound)
        return w, b

    outer_ln = (jnp.ones((1, n_embs), jnp.float32), jnp.zeros((1, n_embs), jnp.float32))

    per = {name: [] for name in _STACK_ORDER}
    for _ in range(n_block):
        key, *ks = jax.random.split(key, 7)
        wq, bq = lin(ks[0], n_embs, n_embs)
        wk, bk = lin(ks[1], n_embs, n_embs)
        wv, bv = lin(ks[2], n_embs, n_embs)
        wo, bo = lin(ks[3], n_embs, n_embs)
        w1, b1 = lin(ks[4], n_embs, dim_ff)
        w2, b2 = lin(ks[5], dim_ff, n_embs)
        per['ln1a'].append(jnp.ones((1, n_embs), jnp.float32))
        per['ln1b'].append(jnp.zeros((1, n_embs), jnp.float32))
        per['wqkv'].append(jnp.concatenate([wq, wk, wv], axis=1))   # (D, 3D)
        per['bqkv'].append(jnp.concatenate([bq, bk, bv], axis=1))   # (1, 3D)
        per['wo'].append(wo)
        per['bo'].append(bo)
        per['ln2a'].append(jnp.ones((1, n_embs), jnp.float32))
        per['ln2b'].append(jnp.zeros((1, n_embs), jnp.float32))
        per['w1'].append(w1)
        per['b1'].append(b1)
        per['w2'].append(w2)
        per['b2'].append(b2)

    stacked = [jnp.stack(per[name]) for name in _STACK_ORDER]
    return outer_ln, stacked


# ------------------------------- pure-JAX reference -------------------------------

def _ref_layernorm(x, a, b, eps=1e-6):
    mean = jnp.mean(x, axis=-1, keepdims=True)
    diff = x - mean
    std = jnp.sqrt(jnp.sum(diff * diff, axis=-1, keepdims=True) / (x.shape[-1] - 1))
    return a * diff / (std + eps) + b


def _ref_forward(x, outer_ln, stacked, n_head):
    B, S, D = x.shape
    d_k = D // n_head
    (ln1a, ln1b, wqkv, bqkv, wo, bo, ln2a, ln2b, w1, b1, w2, b2) = stacked
    x = _ref_layernorm(x, *outer_ln)
    for l in range(ln1a.shape[0]):
        h = _ref_layernorm(x, ln1a[l], ln1b[l])
        qkv = h @ wqkv[l] + bqkv[l]
        q, k, v = jnp.split(qkv, 3, axis=-1)
        q = q.reshape(B, S, n_head, d_k).transpose(0, 2, 1, 3)
        k = k.reshape(B, S, n_head, d_k).transpose(0, 2, 1, 3)
        v = v.reshape(B, S, n_head, d_k).transpose(0, 2, 1, 3)
        s = jnp.einsum('bhqd,bhkd->bhqk', q, k) / math.sqrt(d_k)
        p_ = jax.nn.softmax(s, axis=-1)
        o = jnp.einsum('bhqk,bhkd->bhqd', p_, v).transpose(0, 2, 1, 3).reshape(B, S, D)
        x = x + (o @ wo[l] + bo[l])
        h2 = _ref_layernorm(x, ln2a[l], ln2b[l])
        x = x + (jnp.maximum(h2 @ w1[l] + b1[l], 0.0) @ w2[l] + b2[l])
    return x


# ------------------------------------- main ---------------------------------------

if __name__ == "__main__":
    n_embs, dim_ff, n_head, n_block = 32, 64, 4, 2
    B, S = 2, 8

    key = jax.random.PRNGKey(0)
    key_x, key_p = jax.random.split(key)
    x = jax.random.normal(key_x, (B, S, n_embs), jnp.float32)

    outer_ln, stacked = init_params(key_p, n_embs, dim_ff, n_block)

    out = jax.block_until_ready(transformer_forward(x, outer_ln, stacked, n_head))
    ref = _ref_forward(x, outer_ln, stacked, n_head)

    assert out.shape == (B, S, n_embs)
    # slightly relaxed vs f32 exactness because the softmax uses the approximate
    # EUP reciprocal (~1e-4 relative error).
    assert jnp.allclose(out, ref, rtol=2e-3, atol=2e-3), "mismatch vs pure-JAX reference"

    print("KERNEL_OK")
</pallas_src>

<mosaic_0001>
module attributes {stable_mosaic.version = 11 : i64} {
  func.func @transformer_kernel(%arg0: memref<16x32xf32, #tpu.memory_space<vmem>>, %arg1: memref<1x32xf32, #tpu.memory_space<vmem>>, %arg2: memref<1x32xf32, #tpu.memory_space<vmem>>, %arg3: memref<2x1x32xf32, #tpu.memory_space<vmem>>, %arg4: memref<2x1x32xf32, #tpu.memory_space<vmem>>, %arg5: memref<2x32x96xf32, #tpu.memory_space<vmem>>, %arg6: memref<2x1x96xf32, #tpu.memory_space<vmem>>, %arg7: memref<2x32x32xf32, #tpu.memory_space<vmem>>, %arg8: memref<2x1x32xf32, #tpu.memory_space<vmem>>, %arg9: memref<2x1x32xf32, #tpu.memory_space<vmem>>, %arg10: memref<2x1x32xf32, #tpu.memory_space<vmem>>, %arg11: memref<2x32x64xf32, #tpu.memory_space<vmem>>, %arg12: memref<2x1x64xf32, #tpu.memory_space<vmem>>, %arg13: memref<2x64x32xf32, #tpu.memory_space<vmem>>, %arg14: memref<2x1x32xf32, #tpu.memory_space<vmem>>, %arg15: memref<16x32xf32, #tpu.memory_space<vmem>>) attributes {dimension_semantics = [], scalar_prefetch = 0 : i64, scratch_operands = 0 : i64, tpu.core_type = #tpu.core_type<tc>} {
    %c0 = arith.constant 0 : index
    %c0_0 = arith.constant 0 : index
    %0 = vector.load %arg0[%c0, %c0_0] : memref<16x32xf32, #tpu.memory_space<vmem>>, vector<16x32xf32>
    %c0_1 = arith.constant 0 : index
    %c0_2 = arith.constant 0 : index
    %1 = vector.load %arg1[%c0_1, %c0_2] : memref<1x32xf32, #tpu.memory_space<vmem>>, vector<1x32xf32>
    %c0_3 = arith.constant 0 : index
    %c0_4 = arith.constant 0 : index
    %2 = vector.load %arg2[%c0_3, %c0_4] : memref<1x32xf32, #tpu.memory_space<vmem>>, vector<1x32xf32>
    %cst = arith.constant dense<0.000000e+00> : vector<16xf32>
    %3 = vector.multi_reduction <add>, %0, %cst [1] : vector<16x32xf32> to vector<16xf32>
    %4 = vector.shape_cast %3 : vector<16xf32> to vector<16x1xf32>
    %cst_5 = arith.constant 3.200000e+01 : f32
    %5 = vector.broadcast %cst_5 : f32 to vector<16x1xf32>
    %6 = arith.divf %4, %5 : vector<16x1xf32>
    %7 = vector.broadcast %6 : vector<16x1xf32> to vector<16x32xf32>
    %8 = arith.subf %0, %7 : vector<16x32xf32>
    %9 = arith.mulf %8, %8 : vector<16x32xf32>
    %cst_6 = arith.constant dense<0.000000e+00> : vector<16xf32>
    %10 = vector.multi_reduction <add>, %9, %cst_6 [1] : vector<16x32xf32> to vector<16xf32>
    %11 = vector.shape_cast %10 : vector<16xf32> to vector<16x1xf32>
    %cst_7 = arith.constant 0.0322580636 : f32
    %12 = vector.broadcast %cst_7 : f32 to vector<16x1xf32>
    %13 = arith.mulf %11, %12 : vector<16x1xf32>
    %14 = math.sqrt %13 : vector<16x1xf32>
    %15 = vector.broadcast %1 : vector<1x32xf32> to vector<16x32xf32>
    %16 = arith.mulf %15, %8 : vector<16x32xf32>
    %cst_8 = arith.constant 9.99999997E-7 : f32
    %17 = vector.broadcast %cst_8 : f32 to vector<16x1xf32>
    %18 = arith.addf %14, %17 : vector<16x1xf32>
    %19 = vector.broadcast %18 : vector<16x1xf32> to vector<16x32xf32>
    %20 = arith.divf %16, %19 : vector<16x32xf32>
    %21 = vector.broadcast %2 : vector<1x32xf32> to vector<16x32xf32>
    %22 = arith.addf %20, %21 : vector<16x32xf32>
    %c0_9 = arith.constant 0 : index
    %c0_10 = arith.constant 0 : index
    %c0_11 = arith.constant 0 : index
    %23 = vector.load %arg3[%c0_9, %c0_10, %c0_11] : memref<2x1x32xf32, #tpu.memory_space<vmem>>, vector<1x1x32xf32>
    %24 = vector.shape_cast %23 : vector<1x1x32xf32> to vector<1x32xf32>
    %c0_12 = arith.constant 0 : index
    %c0_13 = arith.constant 0 : index
    %c0_14 = arith.constant 0 : index
    %25 = vector.load %arg4[%c0_12, %c0_13, %c0_14] : memref<2x1x32xf32, #tpu.memory_space<vmem>>, vector<1x1x32xf32>
    %26 = vector.shape_cast %25 : vector<1x1x32xf32> to vector<1x32xf32>
    %cst_15 = arith.constant dense<0.000000e+00> : vector<16xf32>
    %27 = vector.multi_reduction <add>, %22, %cst_15 [1] : vector<16x32xf32> to vector<16xf32>
    %28 = vector.shape_cast %27 : vector<16xf32> to vector<16x1xf32>
    %cst_16 = arith.constant 3.200000e+01 : f32
    %29 = vector.broadcast %cst_16 : f32 to vector<16x1xf32>
    %30 = arith.divf %28, %29 : vector<16x1xf32>
    %31 = vector.broadcast %30 : vector<16x1xf32> to vector<16x32xf32>
    %32 = arith.subf %22, %31 : vector<16x32xf32>
    %33 = arith.mulf %32, %32 : vector<16x32xf32>
    %cst_17 = arith.constant dense<0.000000e+00> : vector<16xf32>
    %34 = vector.multi_reduction <add>, %33, %cst_17 [1] : vector<16x32xf32> to vector<16xf32>
    %35 = vector.shape_cast %34 : vector<16xf32> to vector<16x1xf32>
    %cst_18 = arith.constant 0.0322580636 : f32
    %36 = vector.broadcast %cst_18 : f32 to vector<16x1xf32>
    %37 = arith.mulf %35, %36 : vector<16x1xf32>
    %38 = math.sqrt %37 : vector<16x1xf32>
    %39 = vector.broadcast %24 : vector<1x32xf32> to vector<16x32xf32>
    %40 = arith.mulf %39, %32 : vector<16x32xf32>
    %cst_19 = arith.constant 9.99999997E-7 : f32
    %41 = vector.broadcast %cst_19 : f32 to vector<16x1xf32>
    %42 = arith.addf %38, %41 : vector<16x1xf32>
    %43 = vector.broadcast %42 : vector<16x1xf32> to vector<16x32xf32>
    %44 = arith.divf %40, %43 : vector<16x32xf32>
    %45 = vector.broadcast %26 : vector<1x32xf32> to vector<16x32xf32>
    %46 = arith.addf %44, %45 : vector<16x32xf32>
    %c0_20 = arith.constant 0 : index
    %c0_21 = arith.constant 0 : index
    %c0_22 = arith.constant 0 : index
    %47 = vector.load %arg5[%c0_20, %c0_21, %c0_22] : memref<2x32x96xf32, #tpu.memory_space<vmem>>, vector<1x32x96xf32>
    %48 = vector.shape_cast %47 : vector<1x32x96xf32> to vector<32x96xf32>
    %cst_23 = arith.constant dense<0.000000e+00> : vector<16x96xf32>
    %49 = tpu.matmul %46, %48, %cst_23 {dimension_numbers = #tpu.dot_dimension_numbers<[1], [0], [0], [1], [0, 0, 1, 1], [], []>} : vector<16x32xf32>, vector<32x96xf32>, vector<16x96xf32> -> vector<16x96xf32>
    %c0_24 = arith.constant 0 : index
    %c0_25 = arith.constant 0 : index
    %c0_26 = arith.constant 0 : index
    %50 = vector.load %arg6[%c0_24, %c0_25, %c0_26] : memref<2x1x96xf32, #tpu.memory_space<vmem>>, vector<1x1x96xf32>
    %51 = vector.shape_cast %50 : vector<1x1x96xf32> to vector<1x96xf32>
    %52 = vector.broadcast %51 : vector<1x96xf32> to vector<16x96xf32>
    %53 = arith.addf %49, %52 : vector<16x96xf32>
    %54 = vector.extract_strided_slice %53 {offsets = [0, 0], sizes = [16, 8], strides = [1, 1]} : vector<16x96xf32> to vector<16x8xf32>
    %55 = vector.shape_cast %54 : vector<16x8xf32> to vector<2x8x8xf32>
    %56 = vector.extract_strided_slice %53 {offsets = [0, 8], sizes = [16, 8], strides = [1, 1]} : vector<16x96xf32> to vector<16x8xf32>
    %57 = vector.shape_cast %56 : vector<16x8xf32> to vector<2x8x8xf32>
    %58 = vector.extract_strided_slice %53 {offsets = [0, 16], sizes = [16, 8], strides = [1, 1]} : vector<16x96xf32> to vector<16x8xf32>
    %59 = vector.shape_cast %58 : vector<16x8xf32> to vector<2x8x8xf32>
    %60 = vector.extract_strided_slice %53 {offsets = [0, 24], sizes = [16, 8], strides = [1, 1]} : vector<16x96xf32> to vector<16x8xf32>
    %61 = vector.shape_cast %60 : vector<16x8xf32> to vector<2x8x8xf32>
    %62 = tpu.concatenate %55, %57, %59, %61 in 0 : vector<2x8x8xf32>, vector<2x8x8xf32>, vector<2x8x8xf32>, vector<2x8x8xf32> -> vector<8x8x8xf32>
    %63 = vector.extract_strided_slice %53 {offsets = [0, 32], sizes = [16, 8], strides = [1, 1]} : vector<16x96xf32> to vector<16x8xf32>
    %64 = vector.shape_cast %63 : vector<16x8xf32> to vector<2x8x8xf32>
    %65 = vector.extract_strided_slice %53 {offsets = [0, 40], sizes = [16, 8], strides = [1, 1]} : vector<16x96xf32> to vector<16x8xf32>
    %66 = vector.shape_cast %65 : vector<16x8xf32> to vector<2x8x8xf32>
    %67 = vector.extract_strided_slice %53 {offsets = [0, 48], sizes = [16, 8], strides = [1, 1]} : vector<16x96xf32> to vector<16x8xf32>
    %68 = vector.shape_cast %67 : vector<16x8xf32> to vector<2x8x8xf32>
    %69 = vector.extract_strided_slice %53 {offsets = [0, 56], sizes = [16, 8], strides = [1, 1]} : vector<16x96xf32> to vector<16x8xf32>
    %70 = vector.shape_cast %69 : vector<16x8xf32> to vector<2x8x8xf32>
    %71 = tpu.concatenate %64, %66, %68, %70 in 0 : vector<2x8x8xf32>, vector<2x8x8xf32>, vector<2x8x8xf32>, vector<2x8x8xf32> -> vector<8x8x8xf32>
    %72 = vector.extract_strided_slice %53 {offsets = [0, 64], sizes = [16, 8], strides = [1, 1]} : vector<16x96xf32> to vector<16x8xf32>
    %73 = vector.shape_cast %72 : vector<16x8xf32> to vector<2x8x8xf32>
    %74 = vector.extract_strided_slice %53 {offsets = [0, 72], sizes = [16, 8], strides = [1, 1]} : vector<16x96xf32> to vector<16x8xf32>
    %75 = vector.shape_cast %74 : vector<16x8xf32> to vector<2x8x8xf32>
    %76 = vector.extract_strided_slice %53 {offsets = [0, 80], sizes = [16, 8], strides = [1, 1]} : vector<16x96xf32> to vector<16x8xf32>
    %77 = vector.shape_cast %76 : vector<16x8xf32> to vector<2x8x8xf32>
    %78 = vector.extract_strided_slice %53 {offsets = [0, 88], sizes = [16, 8], strides = [1, 1]} : vector<16x96xf32> to vector<16x8xf32>
    %79 = vector.shape_cast %78 : vector<16x8xf32> to vector<2x8x8xf32>
    %80 = tpu.concatenate %73, %75, %77, %79 in 0 : vector<2x8x8xf32>, vector<2x8x8xf32>, vector<2x8x8xf32>, vector<2x8x8xf32> -> vector<8x8x8xf32>
    "tpu.trace_start"() <{level = 10 : i32, message = "bqd,bkd->bqk"}> : () -> ()
    %cst_27 = arith.constant dense<0.000000e+00> : vector<8x8x8xf32>
    %81 = tpu.matmul %62, %71, %cst_27 {dimension_numbers = #tpu.dot_dimension_numbers<[2], [2], [1], [1], [0, 0, 0, 1, 1, 1], [0], [0]>} : vector<8x8x8xf32>, vector<8x8x8xf32>, vector<8x8x8xf32> -> vector<8x8x8xf32>
    "tpu.trace_stop"() : () -> ()
    %cst_28 = arith.constant 0.353553385 : f32
    %82 = vector.broadcast %cst_28 : f32 to vector<8x8x8xf32>
    %83 = arith.mulf %81, %82 : vector<8x8x8xf32>
    %cst_29 = arith.constant dense<0xFF800000> : vector<8x8xf32>
    %84 = vector.multi_reduction <maximumf>, %83, %cst_29 [2] : vector<8x8x8xf32> to vector<8x8xf32>
    %85 = vector.shape_cast %84 : vector<8x8xf32> to vector<8x8x1xf32>
    %86 = vector.broadcast %85 : vector<8x8x1xf32> to vector<8x8x8xf32>
    %87 = arith.subf %83, %86 : vector<8x8x8xf32>
    %88 = math.exp %87 : vector<8x8x8xf32>
    %cst_30 = arith.constant dense<0.000000e+00> : vector<8x8xf32>
    %89 = vector.multi_reduction <add>, %88, %cst_30 [2] : vector<8x8x8xf32> to vector<8x8xf32>
    %90 = vector.shape_cast %89 : vector<8x8xf32> to vector<8x8x1xf32>
    %91 = tpu.reciprocal %90 {approx = true} : vector<8x8x1xf32> -> vector<8x8x1xf32>
    %92 = vector.broadcast %91 : vector<8x8x1xf32> to vector<8x8x8xf32>
    %93 = arith.mulf %88, %92 : vector<8x8x8xf32>
    "tpu.trace_start"() <{level = 10 : i32, message = "bqk,bkd->bqd"}> : () -> ()
    %cst_31 = arith.constant dense<0.000000e+00> : vector<8x8x8xf32>
    %94 = tpu.matmul %93, %80, %cst_31 {dimension_numbers = #tpu.dot_dimension_numbers<[2], [1], [1], [2], [0, 0, 0, 1, 1, 2], [0], [0]>} : vector<8x8x8xf32>, vector<8x8x8xf32>, vector<8x8x8xf32> -> vector<8x8x8xf32>
    "tpu.trace_stop"() : () -> ()
    %95 = vector.shape_cast %94 : vector<8x8x8xf32> to vector<4x16x8xf32>
    %c0_32 = arith.constant 0 : index
    %c0_33 = arith.constant 0 : index
    %c0_34 = arith.constant 0 : index
    %96 = vector.load %arg7[%c0_32, %c0_33, %c0_34] : memref<2x32x32xf32, #tpu.memory_space<vmem>>, vector<1x32x32xf32>
    %97 = vector.shape_cast %96 : vector<1x32x32xf32> to vector<32x32xf32>
    %98 = vector.shape_cast %97 : vector<32x32xf32> to vector<4x8x32xf32>
    "tpu.trace_start"() <{level = 10 : i32, message = "hnd,hdm->hnm"}> : () -> ()
    %cst_35 = arith.constant dense<0.000000e+00> : vector<4x16x32xf32>
    %99 = tpu.matmul %95, %98, %cst_35 {dimension_numbers = #tpu.dot_dimension_numbers<[2], [1], [1], [2], [0, 0, 0, 1, 1, 2], [0], [0]>} : vector<4x16x8xf32>, vector<4x8x32xf32>, vector<4x16x32xf32> -> vector<4x16x32xf32>
    "tpu.trace_stop"() : () -> ()
    %cst_36 = arith.constant dense<0.000000e+00> : vector<16x32xf32>
    %100 = vector.multi_reduction <add>, %99, %cst_36 [0] : vector<4x16x32xf32> to vector<16x32xf32>
    %c0_37 = arith.constant 0 : index
    %c0_38 = arith.constant 0 : index
    %c0_39 = arith.constant 0 : index
    %101 = vector.load %arg8[%c0_37, %c0_38, %c0_39] : memref<2x1x32xf32, #tpu.memory_space<vmem>>, vector<1x1x32xf32>
    %102 = vector.shape_cast %101 : vector<1x1x32xf32> to vector<1x32xf32>
    %103 = vector.broadcast %102 : vector<1x32xf32> to vector<16x32xf32>
    %104 = arith.addf %100, %103 : vector<16x32xf32>
    %105 = arith.addf %22, %104 : vector<16x32xf32>
    %c0_40 = arith.constant 0 : index
    %c0_41 = arith.constant 0 : index
    %c0_42 = arith.constant 0 : index
    %106 = vector.load %arg9[%c0_40, %c0_41, %c0_42] : memref<2x1x32xf32, #tpu.memory_space<vmem>>, vector<1x1x32xf32>
    %107 = vector.shape_cast %106 : vector<1x1x32xf32> to vector<1x32xf32>
    %c0_43 = arith.constant 0 : index
    %c0_44 = arith.constant 0 : index
    %c0_45 = arith.constant 0 : index
    %108 = vector.load %arg10[%c0_43, %c0_44, %c0_45] : memref<2x1x32xf32, #tpu.memory_space<vmem>>, vector<1x1x32xf32>
    %109 = vector.shape_cast %108 : vector<1x1x32xf32> to vector<1x32xf32>
    %cst_46 = arith.constant dense<0.000000e+00> : vector<16xf32>
    %110 = vector.multi_reduction <add>, %105, %cst_46 [1] : vector<16x32xf32> to vector<16xf32>
    %111 = vector.shape_cast %110 : vector<16xf32> to vector<16x1xf32>
    %cst_47 = arith.constant 3.200000e+01 : f32
    %112 = vector.broadcast %cst_47 : f32 to vector<16x1xf32>
    %113 = arith.divf %111, %112 : vector<16x1xf32>
    %114 = vector.broadcast %113 : vector<16x1xf32> to vector<16x32xf32>
    %115 = arith.subf %105, %114 : vector<16x32xf32>
    %116 = arith.mulf %115, %115 : vector<16x32xf32>
    %cst_48 = arith.constant dense<0.000000e+00> : vector<16xf32>
    %117 = vector.multi_reduction <add>, %116, %cst_48 [1] : vector<16x32xf32> to vector<16xf32>
    %118 = vector.shape_cast %117 : vector<16xf32> to vector<16x1xf32>
    %cst_49 = arith.constant 0.0322580636 : f32
    %119 = vector.broadcast %cst_49 : f32 to vector<16x1xf32>
    %120 = arith.mulf %118, %119 : vector<16x1xf32>
    %121 = math.sqrt %120 : vector<16x1xf32>
    %122 = vector.broadcast %107 : vector<1x32xf32> to vector<16x32xf32>
    %123 = arith.mulf %122, %115 : vector<16x32xf32>
    %cst_50 = arith.constant 9.99999997E-7 : f32
    %124 = vector.broadcast %cst_50 : f32 to vector<16x1xf32>
    %125 = arith.addf %121, %124 : vector<16x1xf32>
    %126 = vector.broadcast %125 : vector<16x1xf32> to vector<16x32xf32>
    %127 = arith.divf %123, %126 : vector<16x32xf32>
    %128 = vector.broadcast %109 : vector<1x32xf32> to vector<16x32xf32>
    %129 = arith.addf %127, %128 : vector<16x32xf32>
    %c0_51 = arith.constant 0 : index
    %c0_52 = arith.constant 0 : index
    %c0_53 = arith.constant 0 : index
    %130 = vector.load %arg11[%c0_51, %c0_52, %c0_53] : memref<2x32x64xf32, #tpu.memory_space<vmem>>, vector<1x32x64xf32>
    %131 = vector.shape_cast %130 : vector<1x32x64xf32> to vector<32x64xf32>
    %cst_54 = arith.constant dense<0.000000e+00> : vector<16x64xf32>
    %132 = tpu.matmul %129, %131, %cst_54 {dimension_numbers = #tpu.dot_dimension_numbers<[1], [0], [0], [1], [0, 0, 1, 1], [], []>} : vector<16x32xf32>, vector<32x64xf32>, vector<16x64xf32> -> vector<16x64xf32>
    %c0_55 = arith.constant 0 : index
    %c0_56 = arith.constant 0 : index
    %c0_57 = arith.constant 0 : index
    %133 = vector.load %arg12[%c0_55, %c0_56, %c0_57] : memref<2x1x64xf32, #tpu.memory_space<vmem>>, vector<1x1x64xf32>
    %134 = vector.shape_cast %133 : vector<1x1x64xf32> to vector<1x64xf32>
    %135 = vector.broadcast %134 : vector<1x64xf32> to vector<16x64xf32>
    %136 = arith.addf %132, %135 : vector<16x64xf32>
    %cst_58 = arith.constant 0.000000e+00 : f32
    %137 = vector.broadcast %cst_58 : f32 to vector<16x64xf32>
    %138 = arith.maximumf %136, %137 : vector<16x64xf32>
    %c0_59 = arith.constant 0 : index
    %c0_60 = arith.constant 0 : index
    %c0_61 = arith.constant 0 : index
    %139 = vector.load %arg13[%c0_59, %c0_60, %c0_61] : memref<2x64x32xf32, #tpu.memory_space<vmem>>, vector<1x64x32xf32>
    %140 = vector.shape_cast %139 : vector<1x64x32xf32> to vector<64x32xf32>
    %cst_62 = arith.constant dense<0.000000e+00> : vector<16x32xf32>
    %141 = tpu.matmul %138, %140, %cst_62 {dimension_numbers = #tpu.dot_dimension_numbers<[1], [0], [0], [1], [0, 0, 1, 1], [], []>} : vector<16x64xf32>, vector<64x32xf32>, vector<16x32xf32> -> vector<16x32xf32>
    %c0_63 = arith.constant 0 : index
    %c0_64 = arith.constant 0 : index
    %c0_65 = arith.constant 0 : index
    %142 = vector.load %arg14[%c0_63, %c0_64, %c0_65] : memref<2x1x32xf32, #tpu.memory_space<vmem>>, vector<1x1x32xf32>
    %143 = vector.shape_cast %142 : vector<1x1x32xf32> to vector<1x32xf32>
    %144 = vector.broadcast %143 : vector<1x32xf32> to vector<16x32xf32>
    %145 = arith.addf %141, %144 : vector<16x32xf32>
    %146 = arith.addf %105, %145 : vector<16x32xf32>
    %c1 = arith.constant 1 : index
    %c0_66 = arith.constant 0 : index
    %c0_67 = arith.constant 0 : index
    %147 = vector.load %arg3[%c1, %c0_66, %c0_67] : memref<2x1x32xf32, #tpu.memory_space<vmem>>, vector<1x1x32xf32>
    %148 = vector.shape_cast %147 : vector<1x1x32xf32> to vector<1x32xf32>
    %c1_68 = arith.constant 1 : index
    %c0_69 = arith.constant 0 : index
    %c0_70 = arith.constant 0 : index
    %149 = vector.load %arg4[%c1_68, %c0_69, %c0_70] : memref<2x1x32xf32, #tpu.memory_space<vmem>>, vector<1x1x32xf32>
    %150 = vector.shape_cast %149 : vector<1x1x32xf32> to vector<1x32xf32>
    %cst_71 = arith.constant dense<0.000000e+00> : vector<16xf32>
    %151 = vector.multi_reduction <add>, %146, %cst_71 [1] : vector<16x32xf32> to vector<16xf32>
    %152 = vector.shape_cast %151 : vector<16xf32> to vector<16x1xf32>
    %cst_72 = arith.constant 3.200000e+01 : f32
    %153 = vector.broadcast %cst_72 : f32 to vector<16x1xf32>
    %154 = arith.divf %152, %153 : vector<16x1xf32>
    %155 = vector.broadcast %154 : vector<16x1xf32> to vector<16x32xf32>
    %156 = arith.subf %146, %155 : vector<16x32xf32>
    %157 = arith.mulf %156, %156 : vector<16x32xf32>
    %cst_73 = arith.constant dense<0.000000e+00> : vector<16xf32>
    %158 = vector.multi_reduction <add>, %157, %cst_73 [1] : vector<16x32xf32> to vector<16xf32>
    %159 = vector.shape_cast %158 : vector<16xf32> to vector<16x1xf32>
    %cst_74 = arith.constant 0.0322580636 : f32
    %160 = vector.broadcast %cst_74 : f32 to vector<16x1xf32>
    %161 = arith.mulf %159, %160 : vector<16x1xf32>
    %162 = math.sqrt %161 : vector<16x1xf32>
    %163 = vector.broadcast %148 : vector<1x32xf32> to vector<16x32xf32>
    %164 = arith.mulf %163, %156 : vector<16x32xf32>
    %cst_75 = arith.constant 9.99999997E-7 : f32
    %165 = vector.broadcast %cst_75 : f32 to vector<16x1xf32>
    %166 = arith.addf %162, %165 : vector<16x1xf32>
    %167 = vector.broadcast %166 : vector<16x1xf32> to vector<16x32xf32>
    %168 = arith.divf %164, %167 : vector<16x32xf32>
    %169 = vector.broadcast %150 : vector<1x32xf32> to vector<16x32xf32>
    %170 = arith.addf %168, %169 : vector<16x32xf32>
    %c1_76 = arith.constant 1 : index
    %c0_77 = arith.constant 0 : index
    %c0_78 = arith.constant 0 : index
    %171 = vector.load %arg5[%c1_76, %c0_77, %c0_78] : memref<2x32x96xf32, #tpu.memory_space<vmem>>, vector<1x32x96xf32>
    %172 = vector.shape_cast %171 : vector<1x32x96xf32> to vector<32x96xf32>
    %cst_79 = arith.constant dense<0.000000e+00> : vector<16x96xf32>
    %173 = tpu.matmul %170, %172, %cst_79 {dimension_numbers = #tpu.dot_dimension_numbers<[1], [0], [0], [1], [0, 0, 1, 1], [], []>} : vector<16x32xf32>, vector<32x96xf32>, vector<16x96xf32> -> vector<16x96xf32>
    %c1_80 = arith.constant 1 : index
    %c0_81 = arith.constant 0 : index
    %c0_82 = arith.constant 0 : index
    %174 = vector.load %arg6[%c1_80, %c0_81, %c0_82] : memref<2x1x96xf32, #tpu.memory_space<vmem>>, vector<1x1x96xf32>
    %175 = vector.shape_cast %174 : vector<1x1x96xf32> to vector<1x96xf32>
    %176 = vector.broadcast %175 : vector<1x96xf32> to vector<16x96xf32>
    %177 = arith.addf %173, %176 : vector<16x96xf32>
    %178 = vector.extract_strided_slice %177 {offsets = [0, 0], sizes = [16, 8], strides = [1, 1]} : vector<16x96xf32> to vector<16x8xf32>
    %179 = vector.shape_cast %178 : vector<16x8xf32> to vector<2x8x8xf32>
    %180 = vector.extract_strided_slice %177 {offsets = [0, 8], sizes = [16, 8], strides = [1, 1]} : vector<16x96xf32> to vector<16x8xf32>
    %181 = vector.shape_cast %180 : vector<16x8xf32> to vector<2x8x8xf32>
    %182 = vector.extract_strided_slice %177 {offsets = [0, 16], sizes = [16, 8], strides = [1, 1]} : vector<16x96xf32> to vector<16x8xf32>
    %183 = vector.shape_cast %182 : vector<16x8xf32> to vector<2x8x8xf32>
    %184 = vector.extract_strided_slice %177 {offsets = [0, 24], sizes = [16, 8], strides = [1, 1]} : vector<16x96xf32> to vector<16x8xf32>
    %185 = vector.shape_cast %184 : vector<16x8xf32> to vector<2x8x8xf32>
    %186 = tpu.concatenate %179, %181, %183, %185 in 0 : vector<2x8x8xf32>, vector<2x8x8xf32>, vector<2x8x8xf32>, vector<2x8x8xf32> -> vector<8x8x8xf32>
    %187 = vector.extract_strided_slice %177 {offsets = [0, 32], sizes = [16, 8], strides = [1, 1]} : vector<16x96xf32> to vector<16x8xf32>
    %188 = vector.shape_cast %187 : vector<16x8xf32> to vector<2x8x8xf32>
    %189 = vector.extract_strided_slice %177 {offsets = [0, 40], sizes = [16, 8], strides = [1, 1]} : vector<16x96xf32> to vector<16x8xf32>
    %190 = vector.shape_cast %189 : vector<16x8xf32> to vector<2x8x8xf32>
    %191 = vector.extract_strided_slice %177 {offsets = [0, 48], sizes = [16, 8], strides = [1, 1]} : vector<16x96xf32> to vector<16x8xf32>
    %192 = vector.shape_cast %191 : vector<16x8xf32> to vector<2x8x8xf32>
    %193 = vector.extract_strided_slice %177 {offsets = [0, 56], sizes = [16, 8], strides = [1, 1]} : vector<16x96xf32> to vector<16x8xf32>
    %194 = vector.shape_cast %193 : vector<16x8xf32> to vector<2x8x8xf32>
    %195 = tpu.concatenate %188, %190, %192, %194 in 0 : vector<2x8x8xf32>, vector<2x8x8xf32>, vector<2x8x8xf32>, vector<2x8x8xf32> -> vector<8x8x8xf32>
    %196 = vector.extract_strided_slice %177 {offsets = [0, 64], sizes = [16, 8], strides = [1, 1]} : vector<16x96xf32> to vector<16x8xf32>
    %197 = vector.shape_cast %196 : vector<16x8xf32> to vector<2x8x8xf32>
    %198 = vector.extract_strided_slice %177 {offsets = [0, 72], sizes = [16, 8], strides = [1, 1]} : vector<16x96xf32> to vector<16x8xf32>
    %199 = vector.shape_cast %198 : vector<16x8xf32> to vector<2x8x8xf32>
    %200 = vector.extract_strided_slice %177 {offsets = [0, 80], sizes = [16, 8], strides = [1, 1]} : vector<16x96xf32> to vector<16x8xf32>
    %201 = vector.shape_cast %200 : vector<16x8xf32> to vector<2x8x8xf32>
    %202 = vector.extract_strided_slice %177 {offsets = [0, 88], sizes = [16, 8], strides = [1, 1]} : vector<16x96xf32> to vector<16x8xf32>
    %203 = vector.shape_cast %202 : vector<16x8xf32> to vector<2x8x8xf32>
    %204 = tpu.concatenate %197, %199, %201, %203 in 0 : vector<2x8x8xf32>, vector<2x8x8xf32>, vector<2x8x8xf32>, vector<2x8x8xf32> -> vector<8x8x8xf32>
    "tpu.trace_start"() <{level = 10 : i32, message = "bqd,bkd->bqk"}> : () -> ()
    %cst_83 = arith.constant dense<0.000000e+00> : vector<8x8x8xf32>
    %205 = tpu.matmul %186, %195, %cst_83 {dimension_numbers = #tpu.dot_dimension_numbers<[2], [2], [1], [1], [0, 0, 0, 1, 1, 1], [0], [0]>} : vector<8x8x8xf32>, vector<8x8x8xf32>, vector<8x8x8xf32> -> vector<8x8x8xf32>
    "tpu.trace_stop"() : () -> ()
    %cst_84 = arith.constant 0.353553385 : f32
    %206 = vector.broadcast %cst_84 : f32 to vector<8x8x8xf32>
    %207 = arith.mulf %205, %206 : vector<8x8x8xf32>
    %cst_85 = arith.constant dense<0xFF800000> : vector<8x8xf32>
    %208 = vector.multi_reduction <maximumf>, %207, %cst_85 [2] : vector<8x8x8xf32> to vector<8x8xf32>
    %209 = vector.shape_cast %208 : vector<8x8xf32> to vector<8x8x1xf32>
    %210 = vector.broadcast %209 : vector<8x8x1xf32> to vector<8x8x8xf32>
    %211 = arith.subf %207, %210 : vector<8x8x8xf32>
    %212 = math.exp %211 : vector<8x8x8xf32>
    %cst_86 = arith.constant dense<0.000000e+00> : vector<8x8xf32>
    %213 = vector.multi_reduction <add>, %212, %cst_86 [2] : vector<8x8x8xf32> to vector<8x8xf32>
    %214 = vector.shape_cast %213 : vector<8x8xf32> to vector<8x8x1xf32>
    %215 = tpu.reciprocal %214 {approx = true} : vector<8x8x1xf32> -> vector<8x8x1xf32>
    %216 = vector.broadcast %215 : vector<8x8x1xf32> to vector<8x8x8xf32>
    %217 = arith.mulf %212, %216 : vector<8x8x8xf32>
    "tpu.trace_start"() <{level = 10 : i32, message = "bqk,bkd->bqd"}> : () -> ()
    %cst_87 = arith.constant dense<0.000000e+00> : vector<8x8x8xf32>
    %218 = tpu.matmul %217, %204, %cst_87 {dimension_numbers = #tpu.dot_dimension_numbers<[2], [1], [1], [2], [0, 0, 0, 1, 1, 2], [0], [0]>} : vector<8x8x8xf32>, vector<8x8x8xf32>, vector<8x8x8xf32> -> vector<8x8x8xf32>
    "tpu.trace_stop"() : () -> ()
    %219 = vector.shape_cast %218 : vector<8x8x8xf32> to vector<4x16x8xf32>
    %c1_88 = arith.constant 1 : index
    %c0_89 = arith.constant 0 : index
    %c0_90 = arith.constant 0 : index
    %220 = vector.load %arg7[%c1_88, %c0_89, %c0_90] : memref<2x32x32xf32, #tpu.memory_space<vmem>>, vector<1x32x32xf32>
    %221 = vector.shape_cast %220 : vector<1x32x32xf32> to vector<32x32xf32>
    %222 = vector.shape_cast %221 : vector<32x32xf32> to vector<4x8x32xf32>
    "tpu.trace_start"() <{level = 10 : i32, message = "hnd,hdm->hnm"}> : () -> ()
    %cst_91 = arith.constant dense<0.000000e+00> : vector<4x16x32xf32>
    %223 = tpu.matmul %219, %222, %cst_91 {dimension_numbers = #tpu.dot_dimension_numbers<[2], [1], [1], [2], [0, 0, 0, 1, 1, 2], [0], [0]>} : vector<4x16x8xf32>, vector<4x8x32xf32>, vector<4x16x32xf32> -> vector<4x16x32xf32>
    "tpu.trace_stop"() : () -> ()
    %cst_92 = arith.constant dense<0.000000e+00> : vector<16x32xf32>
    %224 = vector.multi_reduction <add>, %223, %cst_92 [0] : vector<4x16x32xf32> to vector<16x32xf32>
    %c1_93 = arith.constant 1 : index
    %c0_94 = arith.constant 0 : index
    %c0_95 = arith.constant 0 : index
    %225 = vector.load %arg8[%c1_93, %c0_94, %c0_95] : memref<2x1x32xf32, #tpu.memory_space<vmem>>, vector<1x1x32xf32>
    %226 = vector.shape_cast %225 : vector<1x1x32xf32> to vector<1x32xf32>
    %227 = vector.broadcast %226 : vector<1x32xf32> to vector<16x32xf32>
    %228 = arith.addf %224, %227 : vector<16x32xf32>
    %229 = arith.addf %146, %228 : vector<16x32xf32>
    %c1_96 = arith.constant 1 : index
    %c0_97 = arith.constant 0 : index
    %c0_98 = arith.constant 0 : index
    %230 = vector.load %arg9[%c1_96, %c0_97, %c0_98] : memref<2x1x32xf32, #tpu.memory_space<vmem>>, vector<1x1x32xf32>
    %231 = vector.shape_cast %230 : vector<1x1x32xf32> to vector<1x32xf32>
    %c1_99 = arith.constant 1 : index
    %c0_100 = arith.constant 0 : index
    %c0_101 = arith.constant 0 : index
    %232 = vector.load %arg10[%c1_99, %c0_100, %c0_101] : memref<2x1x32xf32, #tpu.memory_space<vmem>>, vector<1x1x32xf32>
    %233 = vector.shape_cast %232 : vector<1x1x32xf32> to vector<1x32xf32>
    %cst_102 = arith.constant dense<0.000000e+00> : vector<16xf32>
    %234 = vector.multi_reduction <add>, %229, %cst_102 [1] : vector<16x32xf32> to vector<16xf32>
    %235 = vector.shape_cast %234 : vector<16xf32> to vector<16x1xf32>
    %cst_103 = arith.constant 3.200000e+01 : f32
    %236 = vector.broadcast %cst_103 : f32 to vector<16x1xf32>
    %237 = arith.divf %235, %236 : vector<16x1xf32>
    %238 = vector.broadcast %237 : vector<16x1xf32> to vector<16x32xf32>
    %239 = arith.subf %229, %238 : vector<16x32xf32>
    %240 = arith.mulf %239, %239 : vector<16x32xf32>
    %cst_104 = arith.constant dense<0.000000e+00> : vector<16xf32>
    %241 = vector.multi_reduction <add>, %240, %cst_104 [1] : vector<16x32xf32> to vector<16xf32>
    %242 = vector.shape_cast %241 : vector<16xf32> to vector<16x1xf32>
    %cst_105 = arith.constant 0.0322580636 : f32
    %243 = vector.broadcast %cst_105 : f32 to vector<16x1xf32>
    %244 = arith.mulf %242, %243 : vector<16x1xf32>
    %245 = math.sqrt %244 : vector<16x1xf32>
    %246 = vector.broadcast %231 : vector<1x32xf32> to vector<16x32xf32>
    %247 = arith.mulf %246, %239 : vector<16x32xf32>
    %cst_106 = arith.constant 9.99999997E-7 : f32
    %248 = vector.broadcast %cst_106 : f32 to vector<16x1xf32>
    %249 = arith.addf %245, %248 : vector<16x1xf32>
    %250 = vector.broadcast %249 : vector<16x1xf32> to vector<16x32xf32>
    %251 = arith.divf %247, %250 : vector<16x32xf32>
    %252 = vector.broadcast %233 : vector<1x32xf32> to vector<16x32xf32>
    %253 = arith.addf %251, %252 : vector<16x32xf32>
    %c1_107 = arith.constant 1 : index
    %c0_108 = arith.constant 0 : index
    %c0_109 = arith.constant 0 : index
    %254 = vector.load %arg11[%c1_107, %c0_108, %c0_109] : memref<2x32x64xf32, #tpu.memory_space<vmem>>, vector<1x32x64xf32>
    %255 = vector.shape_cast %254 : vector<1x32x64xf32> to vector<32x64xf32>
    %cst_110 = arith.constant dense<0.000000e+00> : vector<16x64xf32>
    %256 = tpu.matmul %253, %255, %cst_110 {dimension_numbers = #tpu.dot_dimension_numbers<[1], [0], [0], [1], [0, 0, 1, 1], [], []>} : vector<16x32xf32>, vector<32x64xf32>, vector<16x64xf32> -> vector<16x64xf32>
    %c1_111 = arith.constant 1 : index
    %c0_112 = arith.constant 0 : index
    %c0_113 = arith.constant 0 : index
    %257 = vector.load %arg12[%c1_111, %c0_112, %c0_113] : memref<2x1x64xf32, #tpu.memory_space<vmem>>, vector<1x1x64xf32>
    %258 = vector.shape_cast %257 : vector<1x1x64xf32> to vector<1x64xf32>
    %259 = vector.broadcast %258 : vector<1x64xf32> to vector<16x64xf32>
    %260 = arith.addf %256, %259 : vector<16x64xf32>
    %cst_114 = arith.constant 0.000000e+00 : f32
    %261 = vector.broadcast %cst_114 : f32 to vector<16x64xf32>
    %262 = arith.maximumf %260, %261 : vector<16x64xf32>
    %c1_115 = arith.constant 1 : index
    %c0_116 = arith.constant 0 : index
    %c0_117 = arith.constant 0 : index
    %263 = vector.load %arg13[%c1_115, %c0_116, %c0_117] : memref<2x64x32xf32, #tpu.memory_space<vmem>>, vector<1x64x32xf32>
    %264 = vector.shape_cast %263 : vector<1x64x32xf32> to vector<64x32xf32>
    %cst_118 = arith.constant dense<0.000000e+00> : vector<16x32xf32>
    %265 = tpu.matmul %262, %264, %cst_118 {dimension_numbers = #tpu.dot_dimension_numbers<[1], [0], [0], [1], [0, 0, 1, 1], [], []>} : vector<16x64xf32>, vector<64x32xf32>, vector<16x32xf32> -> vector<16x32xf32>
    %c1_119 = arith.constant 1 : index
    %c0_120 = arith.constant 0 : index
    %c0_121 = arith.constant 0 : index
    %266 = vector.load %arg14[%c1_119, %c0_120, %c0_121] : memref<2x1x32xf32, #tpu.memory_space<vmem>>, vector<1x1x32xf32>
    %267 = vector.shape_cast %266 : vector<1x1x32xf32> to vector<1x32xf32>
    %268 = vector.broadcast %267 : vector<1x32xf32> to vector<16x32xf32>
    %269 = arith.addf %265, %268 : vector<16x32xf32>
    %270 = arith.addf %229, %269 : vector<16x32xf32>
    %c0_122 = arith.constant 0 : index
    %c0_123 = arith.constant 0 : index
    %271 = vector.load %arg15[%c0_122, %c0_123] : memref<16x32xf32, #tpu.memory_space<vmem>>, vector<16x32xf32>
    tpu.vector_store %arg15[%c0_122, %c0_123], %270 {strides = array<i32>} : memref<16x32xf32, #tpu.memory_space<vmem>>, vector<16x32xf32>,
    return
  }
}

</mosaic_0001>

<bundles_post_ra>
// kernel: tpu_custom_call.1
= control target key start
LH: loop header
LB: loop body
LE: loop exit
PB: predicated region body
PF: predicated region fallthrough
CT: control target
= control target key end

     0   :  { %20 = vsyncpa [#allocation3], 0  ;;  %s5874_s0 = inlined_call_operand.hbm [shape: f32[16,32], index: 0, kind: input, shape index: {}, may-alias: {0,15}]   ;;  %s5875_s1 = inlined_call_operand.vmem [shape: f32[1,32], index: 1, kind: input, shape index: {}]   ;;  %s5876_s2 = inlined_call_operand.hbm [shape: f32[1,32], index: 2, kind: input, shape index: {}]   ;;  %s5877_s3 = inlined_call_operand.vmem [shape: f32[2,1,32], index: 3, kind: input, shape index: {}]   ;;  %s5878_s4 = inlined_call_operand.vmem [shape: f32[2,1,32], index: 4, kind: input, shape index: {}]   ;;  %s5879_s5 = inlined_call_operand.vmem [shape: f32[2,32,96], index: 5, kind: input, shape index: {}]   ;;  %s5880_s6 = inlined_call_operand.vmem [shape: f32[2,1,96], index: 6, kind: input, shape index: {}]   ;;  %s5881_s7 = inlined_call_operand.vmem [shape: f32[2,32,32], index: 7, kind: input, shape index: {}]   ;;  %s5882_s8 = inlined_call_operand.vmem [shape: f32[2,1,32], index: 8, kind: input, shape index: {}]   ;;  %s5883_s9 = inlined_call_operand.vmem [shape: f32[2,1,32], index: 9, kind: input, shape index: {}]   ;;  %s5884_s10 = inlined_call_operand.vmem [shape: f32[2,1,32], index: 10, kind: input, shape index: {}]   ;;  %s5885_s11 = inlined_call_operand.vmem [shape: f32[2,32,64], index: 11, kind: input, shape index: {}]   ;;  %s5886_s12 = inlined_call_operand.vmem [shape: f32[2,1,64], index: 12, kind: input, shape index: {}]   ;;  %s5887_s13 = inlined_call_operand.vmem [shape: f32[2,64,32], index: 13, kind: input, shape index: {}]   ;;  %s5888_s14 = inlined_call_operand.vmem [shape: f32[2,1,32], index: 14, kind: input, shape index: {}]   ;;  %s5889_s15 = inlined_call_operand.hbm [shape: f32[16,32], index: 15, kind: output, shape index: {}, may-alias: {0,15}]  }
   0x1   :  { %21 = vsyncpa [#allocation6], 0 }
   0x2   :  { %22 = vsyncpa [#allocation4], 0  ;;  %s5119_s18 = smov [#allocation2]   ;;  %s5047_s22 = scalar_lea.hbm %s5874_s0, 256 }
   0x3   :  { %s28_s19 = sshll.u32 %s5119_s18, 4  ;;  %p5048_p0 = scmp.ne.s32.totalorder %s5874_s0, %s5047_s22  ;;  %s29_s19 = int_to_ptr.vmem [resolvable:$true] %s28_s19 }
   0x4   :  { %p5051_p1 = scmp.lt.u32.totalorder %s5047_s22, %s5874_s0 }
   0x6   :  { %p5053_p2 = pnand %p5051_p1, %p5048_p0 }
   0x8   :  { %5056 = shalt.err (!%p5053_p2)
}
   0x9   :  { %s5057_s27 = scalar_lea.vmem %s29_s19, 256  ;;  %p5062_p4 = scmp.lt.s32.totalorder %s29_s19, %s29_s19 }
   0xa   :  { %p5058_p3 = scmp.ne.s32.totalorder %s29_s19, %s5057_s27  ;;  %p5063_p5 = scmp.lt.s32.totalorder %s5057_s27, %s5057_s27 }
   0xc   :  { %p5064_p6 = por %p5063_p5, %p5062_p4 }
   0xe   :  { %p5065_p7 = pnand %p5064_p6, %p5058_p3 }
  0x10   :  { %5068 = shalt.err (!%p5065_p7)
}
  0x11   :  { %s5120_s28 = smov 128   ;;  %s5121_s29 = smov 8  }
  0x12   :  { %34 = dma.hbm_to_vmem [thread:$0]  %s5874_s0, 256, %s29_s19, [#allocation3], %s5120_s28, %s5120_s28, %s5121_s29  }
  0x13   :  { %s5122_s17 = smov [#allocation5]   ;;  %s5069_s22 = scalar_lea.hbm %s5876_s2, 16 }
  0x14   :  { %s43_s18 = sshll.u32 %s5122_s17, 4  ;;  %p5070_p8 = scmp.ne.s32.totalorder %s5876_s2, %s5069_s22  ;;  %s44_s18 = int_to_ptr.vmem [resolvable:$true] %s43_s18 }
  0x15   :  { %p5073_p9 = scmp.lt.u32.totalorder %s5069_s22, %s5876_s2 }
  0x17   :  { %p5075_p10 = pnand %p5073_p9, %p5070_p8 }
  0x19   :  { %5078 = shalt.err (!%p5075_p10)
}
  0x1a   :  { %s5079_s27 = scalar_lea.vmem %s44_s18, 16  ;;  %s5083_s0 = scalar_lea.vmem %s44_s18, 32 }
  0x1b   :  { %p5080_p11 = scmp.ne.s32.totalorder %s44_s18, %s5079_s27  ;;  %p5084_p12 = scmp.lt.s32.totalorder %s44_s18, %s44_s18 }
  0x1c   :  { %p5085_p13 = scmp.lt.s32.totalorder %s5083_s0, %s5079_s27 }
  0x1e   :  { %p5086_p0 = por %p5085_p13, %p5084_p12 }
  0x20   :  { %p5087_p1 = pnand %p5086_p0, %p5080_p11 }
  0x22   :  { %5090 = shalt.err (!%p5087_p1)
}
  0x23   :  { %46 = dma.hbm_to_vmem [thread:$0]  %s5876_s2, 16, %s44_s18, [#allocation6]  }
  0x24   :  { %5113 = dma.done.wait [#allocation3], 256  }
  0x25   :  { %5114 = vsyncadd [#allocation3], 4294967040 }
  0x26   :  { %5115 = dma.done.wait [#allocation6], 16  }
  0x27   :  { %5116 = vsyncadd [#allocation6], 4294967280  ;;  %vm81_vm0 = vcmask 261120   ;;  %v77_v0 = vld [vmem:[#allocation2] sm:$0xff]  ;;  %v78_v1 = vld [vmem:[#allocation2 + $0x8] sm:$0xff]  ;;  %vm5124_vm9 = vmmov 0  }
  0x28   :  { %v82_v2 = vsel %vm81_vm0, %v77_v0, 0.0  ;;  %v85_v3 = vsel %vm81_vm0, %v78_v1, 0.0  ;;  %v4331_v30 = vld [vmem:[%s5875_s1] ss:$0 sm:$0xff]  ;;  %v4332_v33 = vld [vmem:[#allocation5] ss:$0 sm:$0xff] }
  0x29   :  { %83 = vadd.xlane.f32.xlu0 %v82_v2  ;;  %v197_v52 = vld [vmem:[%s5879_s5] sm:$0xff]  ;;  %v198_v53 = vld [vmem:[%s5879_s5 + $0x8] sm:$0xff]  ;;  %v199_v54 = vld [vmem:[%s5879_s5 + $0x10] sm:$0xff]  ;;  %s5125_s2 = smov 120   ;;  %s5126_s16 = smov 112   ;;  %vm305_vm10 = vcmask 64512  }
  0x2a   :  { %v4867_v55 = vpack.c.bf16 %v198_v53, %v197_v52  ;;  %v200_v56 = vld [vmem:[%s5879_s5 + $0x18] sm:$0xff]  ;;  %s5127_s1 = smov 104   ;;  %s5128_s17 = smov 96   ;;  %vm2136_vm15 = vcmask 523264  }
  0x2b   :  { %v4871_v57 = vpack.c.bf16 %v200_v56, %v199_v54  ;;  %s5129_s18 = smov 64  }
  0x2c   :  { %4868 = vmatprep.subr.bf16.mxu0 %v4867_v55 }
  0x2d   :  { %86 = vadd.xlane.f32.xlu0 %v85_v3  ;;  %4870 = vmatpush3.bf16.msra.mxu0 %v4867_v55 }
  0x2e   :  { %4872 = vmatprep.subr.bf16.mxu0 %v4871_v57 }
  0x31   :  { %4874 = vmatpush3.bf16.msra.mxu0 %v4871_v57 }
  0xb6   :  { %v84_v4 = vpop.xlane.xlu0 %83 }
  0xb7   :  { %v89_v5 = vmul.f32 0.03125, %v84_v4 }
  0xb9   :  { %v91_v6 = vsub.f32 %v77_v0, %v89_v5 }
  0xba   :  { %v87_v7 = vpop.xlane.xlu0 %86 }
  0xbb   :  { %v90_v8 = vmul.f32 0.03125, %v87_v7  ;;  %v93_v9 = vmul.f32 %v91_v6, %v91_v6  ;;  %v123_v31 = vmul.f32 %v4331_v30, %v91_v6 }
  0xbd   :  { %v92_v10 = vsub.f32 %v78_v1, %v90_v8  ;;  %v95_v11 = vsel %vm81_vm0, %v93_v9, 0.0 }
  0xbe   :  { %96 = vadd.xlane.f32.xlu1 %v95_v11 }
  0xbf   :  { %v94_v12 = vmul.f32 %v92_v10, %v92_v10  ;;  %v124_v35 = vmul.f32 %v4331_v30, %v92_v10  ;;  %v4333_v10 = vld [vmem:[%s5877_s3] ss:$0 sm:$0xff] }
  0xc1   :  { %v98_v13 = vsel %vm81_vm0, %v94_v12, 0.0 }
  0xc2   :  { %99 = vadd.xlane.f32.xlu1 %v98_v13  ;;  %v4334_v13 = vld [vmem:[%s5878_s4] ss:$0 sm:$0xff] }
 0x14b   :  { %v97_v14 = vpop.xlane.xlu1 %96 }
 0x14c   :  { %v101_v15 = vmul.f32 0.032258064, %v97_v14 }
 0x14e   :  { %4943 = vrsqrt.f32 %v101_v15  ;;  %vm105_vm1 = vcmp.eq.f32.partialorder %v101_v15, inf  ;;  %v108_v20 = vand.u32 2147483648, %v101_v15  ;;  %vm107_vm2 = vcmp.eq.f32.partialorder %v101_v15, 0.0 }
 0x14f   :  { %v100_v16 = vpop.xlane.xlu1 %99 }
 0x150   :  { %v102_v17 = vmul.f32 0.032258064, %v100_v16 }
 0x152   :  { %4945 = vrsqrt.f32 %v102_v17  ;;  %vm112_vm3 = vcmp.eq.f32.partialorder %v102_v17, inf  ;;  %v115_v26 = vand.u32 2147483648, %v102_v17  ;;  %vm114_vm4 = vcmp.eq.f32.partialorder %v102_v17, 0.0 }
 0x158   :  { %v4944_v18 = vpop.eup %4943 }
 0x159   :  { %v104_v19 = vmul.f32 %v4944_v18, %v101_v15 }
 0x15b   :  { %v106_v21 = vsel %vm105_vm1, %v101_v15, %v104_v19 }
 0x15c   :  { %v4946_v22 = vpop.eup %4945  ;;  %v109_v23 = vsel %vm107_vm2, %v108_v20, %v106_v21  ;;  %v4335_v20 = vld [vmem:[%s5880_s6] ss:$0 sm:$0xff]  ;;  %v5123_v21 = vmov 0.0  }
 0x15d   :  { %v111_v24 = vmul.f32 %v4946_v22, %v102_v17  ;;  %v125_v25 = vadd.f32 1e-06, %v109_v23  ;;  %4596 = vmatprep.subr.mxu0 %v5123_v21  ;;  %4601 = vmatprep.subr.mxu1 %v5123_v21 }
 0x15e   :  { %4603 = vmatprep.mubr.msk.f32.mxu1 %vm5124_vm9, %v5123_v21 }
 0x15f   :  { %v113_v27 = vsel %vm112_vm3, %v102_v17, %v111_v24  ;;  %4947 = vrcp.f32 %v125_v25 }
 0x160   :  { %v116_v28 = vsel %vm114_vm4, %v115_v26, %v113_v27 }
 0x161   :  { %v126_v29 = vadd.f32 1e-06, %v116_v28 }
 0x163   :  { %4949 = vrcp.f32 %v126_v29 }
 0x169   :  { %v4948_v32 = vpop.eup %4947 }
 0x16a   :  { %v128_v34 = vmul.f32 %v4948_v32, %v123_v31 }
 0x16c   :  { %v5245_v36 = vadd.f32 %v4332_v33, %v128_v34 }
 0x16d   :  { %v4950_v37 = vpop.eup %4949 }
 0x16e   :  { %v141_v38 = vsel %vm81_vm0, %v5245_v36, 0.0  ;;  %v130_v39 = vmul.f32 %v4950_v37, %v124_v35 }
 0x16f   :  { %142 = vadd.xlane.f32.xlu0 %v141_v38 }
 0x170   :  { %v5249_v40 = vadd.f32 %v4332_v33, %v130_v39 }
 0x172   :  { %v144_v41 = vsel %vm81_vm0, %v5249_v40, 0.0 }
 0x173   :  { %145 = vadd.xlane.f32.xlu1 %v144_v41 }
 0x1fc   :  { %v143_v42 = vpop.xlane.xlu0 %142 }
 0x1fd   :  { %v147_v43 = vmul.f32 0.03125, %v143_v42 }
 0x1ff   :  { %v149_v44 = vsub.f32 %v5245_v36, %v147_v43 }
 0x200   :  { %v146_v45 = vpop.xlane.xlu1 %145 }
 0x201   :  { %v148_v46 = vmul.f32 0.03125, %v146_v45  ;;  %v151_v47 = vmul.f32 %v149_v44, %v149_v44  ;;  %v181_v11 = vmul.f32 %v4333_v10, %v149_v44 }
 0x203   :  { %v150_v48 = vsub.f32 %v5249_v40, %v148_v46  ;;  %v153_v49 = vsel %vm81_vm0, %v151_v47, 0.0 }
 0x204   :  { %154 = vadd.xlane.f32.xlu0 %v153_v49 }
 0x205   :  { %v152_v50 = vmul.f32 %v150_v48, %v150_v48  ;;  %v182_v15 = vmul.f32 %v4333_v10, %v150_v48 }
 0x207   :  { %v156_v51 = vsel %vm81_vm0, %v152_v50, 0.0 }
 0x208   :  { %157 = vadd.xlane.f32.xlu1 %v156_v51 }
 0x291   :  { %v155_v58 = vpop.xlane.xlu0 %154 }
 0x292   :  { %v159_v59 = vmul.f32 0.032258064, %v155_v58 }
 0x294   :  { %4951 = vrsqrt.f32 %v159_v59  ;;  %vm163_vm5 = vcmp.eq.f32.partialorder %v159_v59, inf  ;;  %v166_v0 = vand.u32 2147483648, %v159_v59  ;;  %vm165_vm6 = vcmp.eq.f32.partialorder %v159_v59, 0.0 }
 0x295   :  { %v158_v60 = vpop.xlane.xlu1 %157 }
 0x296   :  { %v160_v61 = vmul.f32 0.032258064, %v158_v60 }
 0x298   :  { %4953 = vrsqrt.f32 %v160_v61  ;;  %vm170_vm7 = vcmp.eq.f32.partialorder %v160_v61, inf  ;;  %v173_v6 = vand.u32 2147483648, %v160_v61  ;;  %vm172_vm8 = vcmp.eq.f32.partialorder %v160_v61, 0.0 }
 0x29e   :  { %v4952_v62 = vpop.eup %4951 }
 0x29f   :  { %v162_v63 = vmul.f32 %v4952_v62, %v159_v59 }
 0x2a1   :  { %v164_v1 = vsel %vm163_vm5, %v159_v59, %v162_v63 }
 0x2a2   :  { %v4954_v2 = vpop.eup %4953  ;;  %v167_v3 = vsel %vm165_vm6, %v166_v0, %v164_v1 }
 0x2a3   :  { %v169_v4 = vmul.f32 %v4954_v2, %v160_v61  ;;  %v183_v5 = vadd.f32 1e-06, %v167_v3 }
 0x2a5   :  { %v171_v7 = vsel %vm170_vm7, %v160_v61, %v169_v4  ;;  %4955 = vrcp.f32 %v183_v5 }
 0x2a6   :  { %v174_v8 = vsel %vm172_vm8, %v173_v6, %v171_v7 }
 0x2a7   :  { %v184_v9 = vadd.f32 1e-06, %v174_v8 }
 0x2a9   :  { %4957 = vrcp.f32 %v184_v9 }
 0x2af   :  { %v4956_v12 = vpop.eup %4955 }
 0x2b0   :  { %v186_v14 = vmul.f32 %v4956_v12, %v181_v11 }
 0x2b2   :  { %v195_v16 = vadd.f32 %v4334_v13, %v186_v14 }
 0x2b3   :  { %v4958_v17 = vpop.eup %4957 }
 0x2b4   :  { %v188_v18 = vmul.f32 %v4958_v17, %v182_v15  ;;  %4593 = vmatprep.mubr.msk.f32.mxu0 %vm81_vm0, %v195_v16 }
 0x2b6   :  { %v196_v19 = vadd.f32 %v4334_v13, %v188_v18 }
 0x2b8   :  { %4594 = vmatmul.mubr.msk.f32.vlgmr.msra.gmra.mrb[0].mxu0 %vm81_vm0, %v196_v19 }
 0x2b9   :  { %4598 = vmatprep.mubr.msk.f32.mxu0 %vm5124_vm9, %v5123_v21 }
 0x38b   :  { %v4595_v22 = vpop.f32.mrb[0].mxu0 }
 0x38c   :  { %v5286_v23 = vadd.f32 %v4595_v22, %v4335_v20  ;;  %v280_v24 = vpop.f32.mrb[1].mxu0 }
 0x38d   :  { %v5288_v25 = vadd.f32 %v4335_v20, %v280_v24 }
 0x38e   :  { %293 = vrot.lane.b32.xlu1 %v5286_v23, %s5125_s2 }
 0x38f   :  { %291 = vrot.lane.b32.xlu0 %v5288_v25, %s5125_s2 }
 0x392   :  { %295 = vrot.lane.b32.xlu1 %v5288_v25, %s5126_s16 }
 0x393   :  { %299 = vrot.lane.b32.xlu0 %v5288_v25, %s5127_s1 }
 0x396   :  { %297 = vrot.lane.b32.xlu1 %v5286_v23, %s5126_s16 }
 0x397   :  { %303 = vrot.lane.b32.xlu0 %v5288_v25, %s5128_s17 }
 0x39a   :  { %301 = vrot.lane.b32.xlu1 %v5286_v23, %s5127_s1 }
 0x39e   :  { %380 = vrot.lane.b32.xlu1 %v5286_v23, %s5128_s17 }
 0x400   :  { %v5306_v26 = vpop.permute.xlu1 %293 }
 0x401   :  { %532 = vrot.lane.b32.xlu1 %v5306_v26, %s5128_s17  ;;  %v5310_v27 = vpop.permute.xlu0 %291 }
 0x402   :  { %456 = vrot.lane.b32.xlu0 %v5310_v27, %s5128_s17 }
 0x404   :  { %v5314_v28 = vpop.permute.xlu1 %295 }
 0x405   :  { %v5316_v29 = vpop.permute.xlu0 %299 }
 0x406   :  { %608 = vrot.lane.b32.xlu0 %v5314_v28, %s5128_s17 }
 0x408   :  { %v5320_v30 = vpop.permute.xlu1 %297 }
 0x409   :  { %684 = vrot.lane.b32.xlu1 %v5320_v30, %s5128_s17  ;;  %v304_v31 = vpop.permute.xlu0 %303 }
 0x40a   :  { %760 = vrot.lane.b32.xlu0 %v5316_v29, %s5128_s17  ;;  %4597 = vmatpush3.xpose.msk.msra.mxu0 %vm305_vm10, %v304_v31 }
 0x40b   :  { %4606 = vmatprep.subr.mxu0 %v5123_v21 }
 0x40c   :  { %v5328_v32 = vpop.permute.xlu1 %301 }
 0x40d   :  { %836 = vrot.lane.b32.xlu1 %v5328_v32, %s5128_s17  ;;  %4599 = vmatmul.mubr.msk.f32.vlgmr.msra.gmra.mrb[2].mxu0 %vm305_vm10, %v5288_v25 }
 0x40e   :  { %4608 = vmatprep.mubr.msk.f32.mxu0 %vm5124_vm9, %v5123_v21 }
 0x410   :  { %v381_v33 = vpop.permute.xlu1 %380 }
 0x411   :  { %4602 = vmatpush3.xpose.msk.msra.mxu1 %vm305_vm10, %v381_v33 }
 0x412   :  { %4611 = vmatprep.subr.mxu1 %v5123_v21 }
 0x414   :  { %4604 = vmatmul.mubr.msk.f32.vlgmr.msra.gmra.mrb[0].mxu1 %vm305_vm10, %v5286_v23 }
 0x415   :  { %4613 = vmatprep.mubr.msk.f32.mxu1 %vm5124_vm9, %v5123_v21 }
 0x473   :  { %v533_v34 = vpop.permute.xlu1 %532 }
 0x474   :  { %4612 = vmatpush3.xpose.msk.msra.mxu1 %vm305_vm10, %v533_v34  ;;  %v457_v35 = vpop.permute.xlu0 %456 }
 0x475   :  { %4607 = vmatpush3.xpose.msk.msra.mxu0 %vm305_vm10, %v457_v35  ;;  %4621 = vmatprep.subr.mxu1 %v5123_v21 }
 0x476   :  { %4616 = vmatprep.subr.mxu0 %v5123_v21 }
 0x477   :  { %4614 = vmatmul.mubr.msk.f32.vlgmr.msra.gmra.mrb[2].mxu1 %vm305_vm10, %v5306_v26 }
 0x478   :  { %4609 = vmatmul.mubr.msk.f32.vlgmr.msra.gmra.mrb[4].mxu0 %vm305_vm10, %v5310_v27  ;;  %v609_v37 = vpop.permute.xlu0 %608  ;;  %4623 = vmatprep.mubr.msk.f32.mxu1 %vm5124_vm9, %v5123_v21 }
 0x479   :  { %4617 = vmatpush3.xpose.msk.msra.mxu0 %vm305_vm10, %v609_v37  ;;  %4618 = vmatprep.mubr.msk.f32.mxu0 %vm5124_vm9, %v5123_v21 }
 0x47a   :  { %4626 = vmatprep.subr.mxu0 %v5123_v21 }
 0x47b   :  { %v685_v38 = vpop.permute.xlu1 %684 }
 0x47c   :  { %4619 = vmatmul.mubr.msk.f32.vlgmr.msra.gmra.mrb[6].mxu0 %vm305_vm10, %v5314_v28  ;;  %4622 = vmatpush3.xpose.msk.msra.mxu1 %vm305_vm10, %v685_v38  ;;  %v761_v39 = vpop.permute.xlu0 %760 }
 0x47d   :  { %4627 = vmatpush3.xpose.msk.msra.mxu0 %vm305_vm10, %v761_v39  ;;  %4631 = vmatprep.subr.mxu1 %v5123_v21 }
 0x47e   :  { %4628 = vmatprep.mubr.msk.f32.mxu0 %vm5124_vm9, %v5123_v21  ;;  %4636 = vmatprep.subr.mxu0 %v5123_v21 }
 0x47f   :  { %4624 = vmatmul.mubr.msk.f32.vlgmr.msra.gmra.mrb[4].mxu1 %vm305_vm10, %v5320_v30  ;;  %v837_v41 = vpop.permute.xlu1 %836 }
 0x480   :  { %4629 = vmatmul.mubr.msk.f32.vlgmr.msra.gmra.mrb[8].mxu0 %vm305_vm10, %v5316_v29  ;;  %4632 = vmatpush3.xpose.msk.msra.mxu1 %vm305_vm10, %v837_v41 }
 0x481   :  { %4633 = vmatprep.mubr.msk.f32.mxu1 %vm5124_vm9, %v5123_v21  ;;  %4641 = vmatprep.subr.mxu1 %v5123_v21 }
 0x482   :  { %4638 = vmatprep.mubr.msk.f32.mxu0 %vm5124_vm9, %v5123_v21 }
 0x483   :  { %4634 = vmatmul.mubr.msk.f32.vlgmr.msra.gmra.mrb[6].mxu1 %vm305_vm10, %v5328_v32 }
 0x484   :  { %4643 = vmatprep.mubr.msk.f32.mxu1 %vm5124_vm9, %v5123_v21 }
 0x4e0   :  { %v376_v42 = vpop.f32.mrb[2].mxu0 }
 0x4e1   :  { %v912_v43 = vmul.f32 0.35355338, %v376_v42  ;;  %v4600_v44 = vpop.f32.mrb[3].mxu0 }
 0x4e3   :  { %v920_v45 = vsel %vm305_vm10, %v912_v43, -inf }
 0x4e4   :  { %921 = vmax.xlane.f32.xlu0 %v920_v45 }
 0x4e7   :  { %v452_v46 = vpop.f32.mrb[0].mxu1 }
 0x4e8   :  { %v913_v47 = vmul.f32 0.35355338, %v452_v46  ;;  %v4605_v48 = vpop.f32.mrb[1].mxu1 }
 0x4ea   :  { %v923_v49 = vsel %vm305_vm10, %v913_v47, -inf }
 0x4eb   :  { %924 = vmax.xlane.f32.xlu1 %v923_v49 }
 0x54a   :  { %v604_v50 = vpop.f32.mrb[2].mxu1 }
 0x54b   :  { %v915_v51 = vmul.f32 0.35355338, %v604_v50  ;;  %v528_v52 = vpop.f32.mrb[4].mxu0  ;;  %v4615_v53 = vpop.f32.mrb[3].mxu1 }
 0x54c   :  { %v4610_v54 = vpop.f32.mrb[5].mxu0  ;;  %v914_v55 = vmul.f32 0.35355338, %v528_v52 }
 0x54d   :  { %v929_v56 = vsel %vm305_vm10, %v915_v51, -inf }
 0x54e   :  { %930 = vmax.xlane.f32.xlu0 %v929_v56  ;;  %v926_v60 = vsel %vm305_vm10, %v914_v55, -inf }
 0x54f   :  { %v680_v57 = vpop.f32.mrb[6].mxu0 }
 0x550   :  { %v4620_v58 = vpop.f32.mrb[7].mxu0  ;;  %v916_v59 = vmul.f32 0.35355338, %v680_v57 }
 0x552   :  { %v756_v61 = vpop.f32.mrb[4].mxu1  ;;  %927 = vmax.xlane.f32.xlu0 %v926_v60  ;;  %v932_v4 = vsel %vm305_vm10, %v916_v59, -inf }
 0x553   :  { %v917_v62 = vmul.f32 0.35355338, %v756_v61  ;;  %v4625_v63 = vpop.f32.mrb[5].mxu1  ;;  %v832_v0 = vpop.f32.mrb[8].mxu0 }
 0x554   :  { %v4630_v1 = vpop.f32.mrb[9].mxu0  ;;  %v918_v2 = vmul.f32 0.35355338, %v832_v0 }
 0x555   :  { %v935_v3 = vsel %vm305_vm10, %v917_v62, -inf }
 0x556   :  { %936 = vmax.xlane.f32.xlu1 %v935_v3  ;;  %v908_v5 = vpop.f32.mrb[6].mxu1  ;;  %933 = vmax.xlane.f32.xlu0 %v932_v4  ;;  %v938_v9 = vsel %vm305_vm10, %v918_v2, -inf }
 0x557   :  { %v919_v6 = vmul.f32 0.35355338, %v908_v5  ;;  %v4635_v7 = vpop.f32.mrb[7].mxu1 }
 0x559   :  { %v941_v8 = vsel %vm305_vm10, %v919_v6, -inf }
 0x55a   :  { %942 = vmax.xlane.f32.xlu1 %v941_v8  ;;  %939 = vmax.xlane.f32.xlu0 %v938_v9 }
 0x56b   :  { %1084 = vrot.lane.b32.xlu1 %v5286_v23, %s5129_s18 }
 0x56f   :  { %1160 = vrot.lane.b32.xlu1 %v5310_v27, %s5129_s18 }
 0x570   :  { %1008 = vrot.lane.b32.xlu0 %v5288_v25, %s5129_s18 }
 0x571   :  { %v922_v10 = vpop.xlane.xlu0 %921 }
 0x572   :  { %v944_v11 = vsub.f32 %v912_v43, %v922_v10 }
 0x573   :  { %1236 = vrot.lane.b32.xlu1 %v5306_v26, %s5129_s18 }
 0x574   :  { %1312 = vrot.lane.b32.xlu0 %v5314_v28, %s5129_s18  ;;  %v952_v12 = vmul.f32 1.442695, %v944_v11 }
 0x576   :  { %4959 = vpow2.f32 %v952_v12 }
 0x577   :  { %1388 = vrot.lane.b32.xlu1 %v5320_v30, %s5129_s18 }
 0x578   :  { %v925_v13 = vpop.xlane.xlu1 %924 }
 0x579   :  { %v945_v14 = vsub.f32 %v913_v47, %v925_v13 }
 0x57b   :  { %v954_v15 = vmul.f32 1.442695, %v945_v14 }
 0x57d   :  { %4961 = vpow2.f32 %v954_v15 }
 0x580   :  { %v5398_v16 = vpop.eup %4959 }
 0x581   :  { %v968_v17 = vsel %vm305_vm10, %v5398_v16, 0.0 }
 0x587   :  { %v5402_v18 = vpop.eup %4961 }
 0x588   :  { %v971_v19 = vsel %vm305_vm10, %v5402_v18, 0.0 }
 0x593   :  { %969 = vadd.xlane.f32.xlu0 %v968_v17 }
 0x59b   :  { %972 = vadd.xlane.f32.xlu1 %v971_v19 }
 0x5db   :  { %v931_v20 = vpop.xlane.xlu0 %930 }
 0x5dc   :  { %v947_v22 = vsub.f32 %v915_v51, %v931_v20 }
 0x5de   :  { %v958_v23 = vmul.f32 1.442695, %v947_v22 }
 0x5df   :  { %v928_v24 = vpop.xlane.xlu0 %927 }
 0x5e0   :  { %4963 = vpow2.f32 %v958_v23  ;;  %v946_v25 = vsub.f32 %v914_v55, %v928_v24  ;;  %v1617_v23 = vld [vmem:[%s5881_s7 + $0x8] sm:$0xff]  ;;  %v1618_v24 = vld [vmem:[%s5881_s7 + $0x10] sm:$0xff] }
 0x5e2   :  { %v956_v26 = vmul.f32 1.442695, %v946_v25  ;;  %v1619_v25 = vld [vmem:[%s5881_s7 + $0x18] sm:$0xff] }
 0x5e3   :  { %v937_v27 = vpop.xlane.xlu1 %936  ;;  %v934_v28 = vpop.xlane.xlu0 %933 }
 0x5e4   :  { %4965 = vpow2.f32 %v956_v26  ;;  %v949_v30 = vsub.f32 %v917_v62, %v937_v27  ;;  %v948_v31 = vsub.f32 %v916_v59, %v934_v28 }
 0x5e6   :  { %v962_v33 = vmul.f32 1.442695, %v949_v30  ;;  %v960_v34 = vmul.f32 1.442695, %v948_v31 }
 0x5e7   :  { %v943_v35 = vpop.xlane.xlu1 %942  ;;  %v940_v37 = vpop.xlane.xlu0 %939 }
 0x5e8   :  { %4967 = vpow2.f32 %v962_v33  ;;  %v951_v38 = vsub.f32 %v919_v6, %v943_v35  ;;  %v950_v39 = vsub.f32 %v918_v2, %v940_v37 }
 0x5e9   :  { %4969 = vpow2.f32 %v960_v34 }
 0x5ea   :  { %v4964_v41 = vpop.eup %4963  ;;  %v966_v42 = vmul.f32 1.442695, %v951_v38  ;;  %v964_v43 = vmul.f32 1.442695, %v950_v39 }
 0x5eb   :  { %v1085_v44 = vpop.permute.xlu1 %1084  ;;  %v1009_v45 = vpop.permute.xlu0 %1008  ;;  %v977_v46 = vsel %vm305_vm10, %v4964_v41, 0.0 }
 0x5ec   :  { %4971 = vpow2.f32 %v966_v42  ;;  %4642 = vmatpush3.msra.mxu1 %v1085_v44  ;;  %978 = vadd.xlane.f32.xlu1 %v977_v46 }
 0x5ed   :  { %4973 = vpow2.f32 %v964_v43  ;;  %4637 = vmatpush3.msra.mxu0 %v1009_v45  ;;  %4651 = vmatprep.subr.mxu1 %v5123_v21 }
 0x5ee   :  { %v4966_v47 = vpop.eup %4965  ;;  %4646 = vmatprep.subr.mxu0 %v5123_v21 }
 0x5ef   :  { %v974_v48 = vsel %vm305_vm10, %v4966_v47, 0.0  ;;  %v1161_v57 = vpop.permute.xlu1 %1160  ;;  %v1313_v58 = vpop.permute.xlu0 %1312 }
 0x5f0   :  { %975 = vadd.xlane.f32.xlu0 %v974_v48 }
 0x5f2   :  { %v4968_v49 = vpop.eup %4967 }
 0x5f3   :  { %v4970_v50 = vpop.eup %4969  ;;  %v983_v51 = vsel %vm305_vm10, %v4968_v49, 0.0  ;;  %v1237_v59 = vpop.permute.xlu1 %1236 }
 0x5f4   :  { %984 = vadd.xlane.f32.xlu1 %v983_v51  ;;  %v980_v52 = vsel %vm305_vm10, %v4970_v50, 0.0 }
 0x5f5   :  { %981 = vadd.xlane.f32.xlu0 %v980_v52 }
 0x5f6   :  { %v5412_v53 = vpop.eup %4971 }
 0x5f7   :  { %v5414_v54 = vpop.eup %4973  ;;  %v989_v55 = vsel %vm305_vm10, %v5412_v53, 0.0  ;;  %v1389_v61 = vpop.permute.xlu1 %1388 }
 0x5f8   :  { %990 = vadd.xlane.f32.xlu1 %v989_v55  ;;  %v986_v56 = vsel %vm305_vm10, %v5414_v54, 0.0 }
 0x5f9   :  { %987 = vadd.xlane.f32.xlu0 %v986_v56 }
 0x609   :  { %1540 = vrot.lane.b32.xlu1 %v5328_v32, %s5129_s18 }
 0x60f   :  { %1464 = vrot.lane.b32.xlu0 %v5316_v29, %s5129_s18 }
 0x620   :  { %v970_v60 = vpop.xlane.xlu0 %969 }
 0x621   :  { %4975 = vrcp.f32 %v970_v60 }
 0x628   :  { %v973_v62 = vpop.xlane.xlu1 %972 }
 0x629   :  { %4977 = vrcp.f32 %v973_v62 }
 0x62b   :  { %v4976_v63 = vpop.eup %4975 }
 0x62c   :  { %v1000_v0 = vmul.f32 %v4976_v63, %v5398_v16  ;;  %v1616_v16 = vld [vmem:[%s5881_s7] sm:$0xff] }
 0x62e   :  { %4639 = vmatmul.mubr.msk.f32.vlgmr.msra.gmra.mrb[10].mxu0 %vm305_vm10, %v1000_v0  ;;  %v4370_v0 = vld [vmem:[%s5882_s8] ss:$0 sm:$0xff] }
 0x62f   :  { %4647 = vmatpush3.msra.mxu0 %v1161_v57  ;;  %4648 = vmatprep.mubr.msk.f32.mxu0 %vm5124_vm9, %v5123_v21 }
 0x630   :  { %4656 = vmatprep.subr.mxu0 %v5123_v21 }
 0x633   :  { %v4978_v29 = vpop.eup %4977 }
 0x634   :  { %v1001_v32 = vmul.f32 %v4978_v29, %v5402_v18 }
 0x636   :  { %4644 = vmatmul.mubr.msk.f32.vlgmr.msra.gmra.mrb[8].mxu1 %vm305_vm10, %v1001_v32 }
 0x637   :  { %4652 = vmatpush3.msra.mxu1 %v1237_v59  ;;  %4653 = vmatprep.mubr.msk.f32.mxu1 %vm5124_vm9, %v5123_v21 }
 0x638   :  { %4661 = vmatprep.subr.mxu1 %v5123_v21 }
 0x679   :  { %v979_v1 = vpop.xlane.xlu1 %978 }
 0x67a   :  { %4979 = vrcp.f32 %v979_v1 }
 0x67d   :  { %v976_v2 = vpop.xlane.xlu0 %975 }
 0x67e   :  { %4981 = vrcp.f32 %v976_v2 }
 0x681   :  { %v985_v3 = vpop.xlane.xlu1 %984 }
 0x682   :  { %4983 = vrcp.f32 %v985_v3  ;;  %v982_v4 = vpop.xlane.xlu0 %981 }
 0x683   :  { %4985 = vrcp.f32 %v982_v4 }
 0x684   :  { %v4980_v5 = vpop.eup %4979 }
 0x685   :  { %v1003_v6 = vmul.f32 %v4980_v5, %v4964_v41  ;;  %v991_v7 = vpop.xlane.xlu1 %990 }
 0x686   :  { %4987 = vrcp.f32 %v991_v7  ;;  %v988_v8 = vpop.xlane.xlu0 %987 }
 0x687   :  { %4989 = vrcp.f32 %v988_v8  ;;  %4654 = vmatmul.mubr.msk.f32.vlgmr.msra.gmra.mrb[10].mxu1 %vm305_vm10, %v1003_v6 }
 0x688   :  { %v4982_v9 = vpop.eup %4981  ;;  %4662 = vmatpush3.msra.mxu1 %v1389_v61  ;;  %4663 = vmatprep.mubr.msk.f32.mxu1 %vm5124_vm9, %v5123_v21 }
 0x689   :  { %v1002_v10 = vmul.f32 %v4982_v9, %v4966_v47  ;;  %4671 = vmatprep.subr.mxu1 %v5123_v21  ;;  %v1541_v15 = vpop.permute.xlu1 %1540 }
 0x68a   :  { %v1465_v18 = vpop.permute.xlu0 %1464 }
 0x68b   :  { %4649 = vmatmul.mubr.msk.f32.vlgmr.msra.gmra.mrb[12].mxu0 %vm305_vm10, %v1002_v10 }
 0x68c   :  { %v4984_v11 = vpop.eup %4983  ;;  %4657 = vmatpush3.msra.mxu0 %v1313_v58  ;;  %4658 = vmatprep.mubr.msk.f32.mxu0 %vm5124_vm9, %v5123_v21 }
 0x68d   :  { %v4986_v12 = vpop.eup %4985  ;;  %v1005_v13 = vmul.f32 %v4984_v11, %v4968_v49  ;;  %4666 = vmatprep.subr.mxu0 %v5123_v21 }
 0x68e   :  { %v1004_v14 = vmul.f32 %v4986_v12, %v4970_v50 }
 0x68f   :  { %4664 = vmatmul.mubr.msk.f32.vlgmr.msra.gmra.mrb[12].mxu1 %vm305_vm10, %v1005_v13 }
 0x690   :  { %v4988_v17 = vpop.eup %4987  ;;  %4659 = vmatmul.mubr.msk.f32.vlgmr.msra.gmra.mrb[14].mxu0 %vm305_vm10, %v1004_v14  ;;  %4672 = vmatpush3.msra.mxu1 %v1541_v15 }
 0x691   :  { %v4990_v19 = vpop.eup %4989  ;;  %v1007_v20 = vmul.f32 %v4988_v17, %v5412_v53  ;;  %4667 = vmatpush3.msra.mxu0 %v1465_v18  ;;  %4668 = vmatprep.mubr.msk.f32.mxu0 %vm5124_vm9, %v5123_v21  ;;  %v2027_v17 = vld [vmem:[%s5885_s11] sm:$0xff]  ;;  %v2028_v18 = vld [vmem:[%s5885_s11 + $0x8] sm:$0xff] }
 0x692   :  { %v1006_v22 = vmul.f32 %v4990_v19, %v5414_v54  ;;  %4673 = vmatprep.mubr.msk.f32.mxu1 %vm5124_vm9, %v5123_v21  ;;  %4676 = vmatprep.subr.mxu0 %v1616_v16  ;;  %v2029_v19 = vld [vmem:[%s5885_s11 + $0x10] sm:$0xff] }
 0x693   :  { %4674 = vmatmul.mubr.msk.f32.vlgmr.msra.gmra.mrb[14].mxu1 %vm305_vm10, %v1007_v20  ;;  %4681 = vmatprep.subr.mxu1 %v1617_v23  ;;  %v4875_v20 = vpack.c.bf16 %v2028_v18, %v2027_v17 }
 0x694   :  { %4669 = vmatmul.mubr.msk.f32.vlgmr.msra.gmra.mrb[16].mxu0 %vm305_vm10, %v1006_v22  ;;  %4682 = vmatpush3.msra.mxu1 %v1617_v23  ;;  %v2030_v22 = vld [vmem:[%s5885_s11 + $0x18] sm:$0xff] }
 0x695   :  { %4677 = vmatpush3.msra.mxu0 %v1616_v16  ;;  %4691 = vmatprep.subr.mxu1 %v1619_v25  ;;  %v4879_v23 = vpack.c.bf16 %v2030_v22, %v2029_v19 }
 0x696   :  { %4686 = vmatprep.subr.mxu0 %v1618_v24 }
 0x701   :  { %v1080_v26 = vpop.f32.mrb[10].mxu0 }
 0x702   :  { %v4640_v27 = vpop.f32.mrb[11].mxu0  ;;  %4678 = vmatprep.mubr.msk.f32.mxu0 %vm305_vm10, %v1080_v26  ;;  %v2123_v26 = vld [vmem:[%s5887_s13 + $0x10] sm:$0xff] }
 0x709   :  { %v1156_v28 = vpop.f32.mrb[8].mxu1 }
 0x70a   :  { %v4645_v30 = vpop.f32.mrb[9].mxu1  ;;  %4679 = vmatmul.mubr.msk.f32.vlgmr.msra.gmra.mrb[18].mxu0 %vm305_vm10, %v1156_v28  ;;  %v2124_v28 = vld [vmem:[%s5887_s13 + $0x18] sm:$0xff] }
 0x70b   :  { %4687 = vmatpush3.msra.mxu0 %v1618_v24  ;;  %v2121_v24 = vld [vmem:[%s5887_s13] sm:$0xff]  ;;  %v4887_v30 = vpack.c.bf16 %v2124_v28, %v2123_v26  ;;  %v4384_v26 = vld [vmem:[%s5879_s5 + $0x28] sm:$0xff] }
 0x70c   :  { %4876 = vmatprep.subr.bf16.mxu0 %v4875_v20 }
 0x75a   :  { %v1308_v31 = vpop.f32.mrb[10].mxu1 }
 0x75b   :  { %v4655_v33 = vpop.f32.mrb[11].mxu1 }
 0x75c   :  { %v2126_v33 = vld [vmem:[%s5887_s13 + $0x28] sm:$0xff] }
 0x75e   :  { %v1232_v34 = vpop.f32.mrb[12].mxu0 }
 0x75f   :  { %v4650_v35 = vpop.f32.mrb[13].mxu0  ;;  %4683 = vmatprep.mubr.msk.f32.mxu1 %vm305_vm10, %v1232_v34 }
 0x760   :  { %4684 = vmatmul.mubr.msk.f32.vlgmr.msra.gmra.mrb[16].mxu1 %vm305_vm10, %v1308_v31  ;;  %v2125_v31 = vld [vmem:[%s5887_s13 + $0x20] sm:$0xff] }
 0x761   :  { %4692 = vmatpush3.msra.mxu1 %v1619_v25  ;;  %v2122_v25 = vld [vmem:[%s5887_s13 + $0x8] sm:$0xff]  ;;  %v4891_v34 = vpack.c.bf16 %v2126_v33, %v2125_v31 }
 0x762   :  { %v1460_v37 = vpop.f32.mrb[12].mxu1  ;;  %v4883_v27 = vpack.c.bf16 %v2122_v25, %v2121_v24  ;;  %v4383_v25 = vld [vmem:[%s5879_s5 + $0x20] sm:$0xff] }
 0x763   :  { %v1384_v38 = vpop.f32.mrb[14].mxu0  ;;  %v4665_v39 = vpop.f32.mrb[13].mxu1  ;;  %v4899_v28 = vpack.c.bf16 %v4384_v26, %v4383_v25 }
 0x764   :  { %v4660_v41 = vpop.f32.mrb[15].mxu0  ;;  %4688 = vmatprep.mubr.msk.f32.mxu0 %vm305_vm10, %v1384_v38  ;;  %4884 = vmatprep.subr.bf16.mxu1 %v4883_v27 }
 0x765   :  { %4689 = vmatmul.mubr.msk.f32.vlgmr.msra.gmra.mrb[20].mxu0 %vm305_vm10, %v1460_v37 }
 0x766   :  { %v1612_v42 = vpop.f32.mrb[14].mxu1  ;;  %4878 = vmatpush3.bf16.msra.mxu0 %v4875_v20 }
 0x767   :  { %v1536_v43 = vpop.f32.mrb[16].mxu0  ;;  %v4675_v44 = vpop.f32.mrb[15].mxu1  ;;  %4880 = vmatprep.subr.bf16.mxu0 %v4879_v23 }
 0x768   :  { %v4670_v45 = vpop.f32.mrb[17].mxu0  ;;  %4693 = vmatprep.mubr.msk.f32.mxu1 %vm305_vm10, %v1536_v43 }
 0x769   :  { %4694 = vmatmul.mubr.msk.f32.vlgmr.msra.gmra.mrb[18].mxu1 %vm305_vm10, %v1612_v42 }
 0x76a   :  { %4882 = vmatpush3.bf16.msra.mxu0 %v4879_v23  ;;  %4886 = vmatpush3.bf16.msra.mxu1 %v4883_v27  ;;  %v4385_v27 = vld [vmem:[%s5879_s5 + $0x30] sm:$0xff] }
 0x76b   :  { %4888 = vmatprep.subr.bf16.mxu1 %v4887_v30  ;;  %4900 = vmatprep.subr.bf16.mxu0 %v4899_v28 }
 0x76e   :  { %4890 = vmatpush3.bf16.msra.mxu1 %v4887_v30  ;;  %v4386_v30 = vld [vmem:[%s5879_s5 + $0x38] sm:$0xff] }
 0x76f   :  { %4892 = vmatprep.subr.bf16.mxu1 %v4891_v34  ;;  %v4903_v31 = vpack.c.bf16 %v4386_v30, %v4385_v27 }
 0x772   :  { %4894 = vmatpush3.bf16.msra.mxu1 %v4891_v34 }
 0x7dd   :  { %v4680_v46 = vpop.f32.mrb[18].mxu0 }
 0x7de   :  { %v1692_v47 = vpop.f32.mrb[19].mxu0  ;;  %v1951_v49 = vsel %vm81_vm0, %v4680_v46, 0.0 }
 0x7df   :  { %v1944_v52 = vsel %vm81_vm0, %v1692_v47, 0.0 }
 0x833   :  { %v4685_v48 = vpop.f32.mrb[16].mxu1 }
 0x834   :  { %v1952_v50 = vsel %vm81_vm0, %v4685_v48, 0.0  ;;  %v1773_v51 = vpop.f32.mrb[17].mxu1 }
 0x835   :  { %v1953_v53 = vadd.f32 %v1952_v50, %v1951_v49  ;;  %v1945_v54 = vsel %vm81_vm0, %v1773_v51, 0.0 }
 0x836   :  { %v1946_v55 = vadd.f32 %v1945_v54, %v1944_v52 }
 0x838   :  { %v4690_v56 = vpop.f32.mrb[20].mxu0 }
 0x839   :  { %v1954_v57 = vsel %vm81_vm0, %v4690_v56, 0.0  ;;  %v1854_v58 = vpop.f32.mrb[21].mxu0  ;;  %v4372_v56 = vld [vmem:[%s5884_s10] ss:$0 sm:$0xff] }
 0x83a   :  { %v1955_v59 = vadd.f32 %v1954_v57, %v1953_v53  ;;  %v1947_v60 = vsel %vm81_vm0, %v1854_v58, 0.0  ;;  %v4371_v53 = vld [vmem:[%s5883_s9] ss:$0 sm:$0xff] }
 0x83b   :  { %v1948_v61 = vadd.f32 %v1947_v60, %v1946_v55 }
 0x83c   :  { %v4695_v62 = vpop.f32.mrb[18].mxu1 }
 0x83d   :  { %v1956_v63 = vsel %vm81_vm0, %v4695_v62, 0.0  ;;  %v1935_v29 = vpop.f32.mrb[19].mxu1 }
 0x83e   :  { %v1957_v32 = vadd.f32 %v1956_v63, %v1955_v59  ;;  %v1949_v1 = vsel %vm81_vm0, %v1935_v29, 0.0  ;;  %v2127_v63 = vld [vmem:[%s5887_s13 + $0x30] sm:$0xff] }
 0x83f   :  { %v1950_v2 = vadd.f32 %v1949_v1, %v1948_v61 }
 0x840   :  { %v1966_v3 = vadd.f32 %v4370_v0, %v1957_v32  ;;  %v4373_v32 = vld [vmem:[%s5886_s12] ss:$0 sm:$0xff] }
 0x841   :  { %v1965_v4 = vadd.f32 %v4370_v0, %v1950_v2  ;;  %v2128_v0 = vld [vmem:[%s5887_s13 + $0x38] sm:$0xff] }
 0x842   :  { %v5484_v5 = vadd.f32 %v1966_v3, %v5249_v40  ;;  %v4895_v29 = vpack.c.bf16 %v2128_v0, %v2127_v63 }
 0x843   :  { %v5487_v6 = vadd.f32 %v1965_v4, %v5245_v36 }
 0x844   :  { %v1974_v7 = vsel %vm81_vm0, %v5484_v5, 0.0  ;;  %4896 = vmatprep.subr.bf16.mxu1 %v4895_v29 }
 0x845   :  { %1975 = vadd.xlane.f32.xlu1 %v1974_v7  ;;  %v1971_v8 = vsel %vm81_vm0, %v5487_v6, 0.0  ;;  %4898 = vmatpush3.bf16.msra.mxu1 %v4895_v29 }
 0x846   :  { %1972 = vadd.xlane.f32.xlu0 %v1971_v8  ;;  %4742 = vmatprep.subr.mxu1 %v5123_v21 }
 0x8d2   :  { %v1976_v9 = vpop.xlane.xlu1 %1975 }
 0x8d3   :  { %v1978_v10 = vmul.f32 0.03125, %v1976_v9  ;;  %v1973_v11 = vpop.xlane.xlu0 %1972  ;;  %v4376_v9 = vld [vmem:[%s5888_s14] ss:$0 sm:$0xff] }
 0x8d4   :  { %v1977_v12 = vmul.f32 0.03125, %v1973_v11 }
 0x8d5   :  { %v1980_v13 = vsub.f32 %v5484_v5, %v1978_v10 }
 0x8d6   :  { %v1979_v40 = vsub.f32 %v5487_v6, %v1977_v12 }
 0x8d7   :  { %v1982_v15 = vmul.f32 %v1980_v13, %v1980_v13  ;;  %v2012_v58 = vmul.f32 %v4371_v53, %v1980_v13 }
 0x8d8   :  { %v1981_v14 = vmul.f32 %v1979_v40, %v1979_v40  ;;  %v2011_v54 = vmul.f32 %v4371_v53, %v1979_v40 }
 0x8d9   :  { %v1986_v16 = vsel %vm81_vm0, %v1982_v15, 0.0 }
 0x8da   :  { %v1983_v36 = vsel %vm81_vm0, %v1981_v14, 0.0 }
 0x8db   :  { %1984 = vadd.xlane.f32.xlu0 %v1983_v36 }
 0x8df   :  { %1987 = vadd.xlane.f32.xlu0 %v1986_v16 }
 0x968   :  { %v1985_v35 = vpop.xlane.xlu0 %1984 }
 0x969   :  { %v1989_v37 = vmul.f32 0.032258064, %v1985_v35 }
 0x96b   :  { %4991 = vrsqrt.f32 %v1989_v37  ;;  %vm1993_vm11 = vcmp.eq.f32.partialorder %v1989_v37, inf  ;;  %v1996_v43 = vand.u32 2147483648, %v1989_v37  ;;  %vm1995_vm12 = vcmp.eq.f32.partialorder %v1989_v37, 0.0 }
 0x96c   :  { %v1988_v38 = vpop.xlane.xlu0 %1987 }
 0x96d   :  { %v1990_v39 = vmul.f32 0.032258064, %v1988_v38 }
 0x96f   :  { %4993 = vrsqrt.f32 %v1990_v39  ;;  %vm2000_vm13 = vcmp.eq.f32.partialorder %v1990_v39, inf  ;;  %v2003_v49 = vand.u32 2147483648, %v1990_v39  ;;  %vm2002_vm14 = vcmp.eq.f32.partialorder %v1990_v39, 0.0 }
 0x975   :  { %v4992_v41 = vpop.eup %4991 }
 0x976   :  { %v1992_v42 = vmul.f32 %v4992_v41, %v1989_v37 }
 0x978   :  { %v1994_v44 = vsel %vm1993_vm11, %v1989_v37, %v1992_v42 }
 0x979   :  { %v4994_v45 = vpop.eup %4993  ;;  %v1997_v46 = vsel %vm1995_vm12, %v1996_v43, %v1994_v44 }
 0x97a   :  { %v1999_v47 = vmul.f32 %v4994_v45, %v1990_v39  ;;  %v2013_v48 = vadd.f32 1e-06, %v1997_v46 }
 0x97c   :  { %v2001_v50 = vsel %vm2000_vm13, %v1990_v39, %v1999_v47  ;;  %4995 = vrcp.f32 %v2013_v48 }
 0x97d   :  { %v2004_v51 = vsel %vm2002_vm14, %v2003_v49, %v2001_v50 }
 0x97e   :  { %v2014_v52 = vadd.f32 1e-06, %v2004_v51  ;;  %v4381_v51 = vld [vmem:[%s5877_s3 + $0x1] ss:$0 sm:$0xff] }
 0x980   :  { %4997 = vrcp.f32 %v2014_v52 }
 0x986   :  { %v4996_v55 = vpop.eup %4995 }
 0x987   :  { %v2016_v57 = vmul.f32 %v4996_v55, %v2011_v54 }
 0x989   :  { %v2025_v59 = vadd.f32 %v4372_v56, %v2016_v57 }
 0x98a   :  { %v4998_v60 = vpop.eup %4997 }
 0x98b   :  { %v2018_v61 = vmul.f32 %v4998_v60, %v2012_v58  ;;  %4704 = vmatprep.mubr.msk.f32.mxu0 %vm81_vm0, %v2025_v59 }
 0x98d   :  { %v2026_v62 = vadd.f32 %v4372_v56, %v2018_v61  ;;  %v4382_v56 = vld [vmem:[%s5878_s4 + $0x1] ss:$0 sm:$0xff] }
 0x98e   :  { %v4388_v61 = vld [vmem:[%s5880_s6 + $0x1] ss:$0 sm:$0xff] }
 0x98f   :  { %4705 = vmatmul.mubr.msk.f32.vlgmr.msra.gmra.mrb[22].mxu0 %vm81_vm0, %v2026_v62 }
 0x990   :  { %4902 = vmatpush3.bf16.msra.mxu0 %v4899_v28 }
 0x991   :  { %4904 = vmatprep.subr.bf16.mxu0 %v4903_v31 }
 0x994   :  { %4906 = vmatpush3.bf16.msra.mxu0 %v4903_v31 }
 0x995   :  { %4737 = vmatprep.subr.mxu0 %v5123_v21 }
 0xa62   :  { %v4706_v1 = vpop.f32.mrb[22].mxu0 }
 0xa63   :  { %v2116_v2 = vadd.f32 %v4706_v1, %v4373_v32  ;;  %v2110_v3 = vpop.f32.mrb[23].mxu0 }
 0xa64   :  { %v2111_v4 = vadd.f32 %v4373_v32, %v2110_v3 }
 0xa65   :  { %v2120_v8 = vmax.f32 %v2116_v2, 0.0 }
 0xa66   :  { %v2119_v7 = vmax.f32 %v2111_v4, 0.0 }
 0xa68   :  { %4723 = vmatprep.mubr.msk.f32.mxu1 %vm2136_vm15, %v2119_v7 }
 0xa69   :  { %4724 = vmatmul.mubr.msk.f32.vlgmr.msra.gmra.mrb[20].mxu1 %vm2136_vm15, %v2120_v8 }
 0xa6a   :  { %4744 = vmatprep.mubr.msk.f32.mxu1 %vm5124_vm9, %v5123_v21 }
 0xb3c   :  { %v4725_v10 = vpop.f32.mrb[20].mxu1 }
 0xb3d   :  { %v2215_v11 = vadd.f32 %v4725_v10, %v4376_v9  ;;  %v2209_v12 = vpop.f32.mrb[21].mxu1 }
 0xb3e   :  { %v2210_v13 = vadd.f32 %v4376_v9, %v2209_v12 }
 0xb3f   :  { %v5553_v40 = vadd.f32 %v2215_v11, %v5484_v5 }
 0xb40   :  { %v5556_v14 = vadd.f32 %v2210_v13, %v5487_v6 }
 0xb41   :  { %v2227_v36 = vsel %vm81_vm0, %v5553_v40, 0.0 }
 0xb42   :  { %2228 = vadd.xlane.f32.xlu1 %v2227_v36  ;;  %v2224_v15 = vsel %vm81_vm0, %v5556_v14, 0.0 }
 0xb43   :  { %2225 = vadd.xlane.f32.xlu0 %v2224_v15 }
 0xbcf   :  { %v2229_v16 = vpop.xlane.xlu1 %2228 }
 0xbd0   :  { %v2231_v17 = vmul.f32 0.03125, %v2229_v16  ;;  %v2226_v18 = vpop.xlane.xlu0 %2225 }
 0xbd1   :  { %v2230_v19 = vmul.f32 0.03125, %v2226_v18 }
 0xbd2   :  { %v2233_v20 = vsub.f32 %v5553_v40, %v2231_v17 }
 0xbd3   :  { %v2232_v5 = vsub.f32 %v5556_v14, %v2230_v19 }
 0xbd4   :  { %v2235_v22 = vmul.f32 %v2233_v20, %v2233_v20  ;;  %v2265_v52 = vmul.f32 %v4381_v51, %v2233_v20 }
 0xbd5   :  { %v2234_v23 = vmul.f32 %v2232_v5, %v2232_v5  ;;  %v2264_v54 = vmul.f32 %v4381_v51, %v2232_v5 }
 0xbd6   :  { %v2239_v6 = vsel %vm81_vm0, %v2235_v22, 0.0 }
 0xbd7   :  { %2240 = vadd.xlane.f32.xlu1 %v2239_v6  ;;  %v2236_v24 = vsel %vm81_vm0, %v2234_v23, 0.0 }
 0xbd8   :  { %2237 = vadd.xlane.f32.xlu0 %v2236_v24 }
 0xc64   :  { %v2241_v33 = vpop.xlane.xlu1 %2240 }
 0xc65   :  { %v2243_v34 = vmul.f32 0.032258064, %v2241_v33  ;;  %v2238_v35 = vpop.xlane.xlu0 %2237 }
 0xc66   :  { %v2242_v37 = vmul.f32 0.032258064, %v2238_v35 }
 0xc67   :  { %4999 = vrsqrt.f32 %v2243_v34  ;;  %vm2253_vm1 = vcmp.eq.f32.partialorder %v2243_v34, inf  ;;  %v2256_v42 = vand.u32 2147483648, %v2243_v34  ;;  %vm2255_vm2 = vcmp.eq.f32.partialorder %v2243_v34, 0.0 }
 0xc68   :  { %5001 = vrsqrt.f32 %v2242_v37  ;;  %vm2246_vm3 = vcmp.eq.f32.partialorder %v2242_v37, inf  ;;  %v2249_v45 = vand.u32 2147483648, %v2242_v37  ;;  %vm2248_vm4 = vcmp.eq.f32.partialorder %v2242_v37, 0.0 }
 0xc71   :  { %v5000_v38 = vpop.eup %4999 }
 0xc72   :  { %v5002_v39 = vpop.eup %5001  ;;  %v2252_v41 = vmul.f32 %v5000_v38, %v2243_v34 }
 0xc73   :  { %v2245_v43 = vmul.f32 %v5002_v39, %v2242_v37 }
 0xc74   :  { %v2254_v44 = vsel %vm2253_vm1, %v2243_v34, %v2252_v41 }
 0xc75   :  { %v2257_v46 = vsel %vm2255_vm2, %v2256_v42, %v2254_v44  ;;  %v2247_v47 = vsel %vm2246_vm3, %v2242_v37, %v2245_v43 }
 0xc76   :  { %v2267_v48 = vadd.f32 1e-06, %v2257_v46  ;;  %v2250_v49 = vsel %vm2248_vm4, %v2249_v45, %v2247_v47 }
 0xc77   :  { %v2266_v50 = vadd.f32 1e-06, %v2250_v49 }
 0xc78   :  { %5003 = vrcp.f32 %v2267_v48 }
 0xc79   :  { %5005 = vrcp.f32 %v2266_v50 }
 0xc82   :  { %v5004_v53 = vpop.eup %5003 }
 0xc83   :  { %v5006_v55 = vpop.eup %5005  ;;  %v2271_v57 = vmul.f32 %v5004_v53, %v2265_v52 }
 0xc84   :  { %v2269_v58 = vmul.f32 %v5006_v55, %v2264_v54 }
 0xc85   :  { %v2279_v60 = vadd.f32 %v4382_v56, %v2271_v57 }
 0xc86   :  { %v2278_v59 = vadd.f32 %v4382_v56, %v2269_v58 }
 0xc88   :  { %4734 = vmatprep.mubr.msk.f32.mxu0 %vm81_vm0, %v2278_v59 }
 0xc89   :  { %4735 = vmatmul.mubr.msk.f32.vlgmr.msra.gmra.mrb[24].mxu0 %vm81_vm0, %v2279_v60 }
 0xc8a   :  { %4739 = vmatprep.mubr.msk.f32.mxu0 %vm5124_vm9, %v5123_v21 }
 0xd5c   :  { %v4736_v62 = vpop.f32.mrb[24].mxu0 }
 0xd5d   :  { %v5592_v63 = vadd.f32 %v4736_v62, %v4388_v61  ;;  %v2365_v0 = vpop.f32.mrb[25].mxu0 }
 0xd5e   :  { %v5594_v29 = vadd.f32 %v4388_v61, %v2365_v0 }
 0xd5f   :  { %2378 = vrot.lane.b32.xlu1 %v5592_v63, %s5125_s2 }
 0xd60   :  { %2376 = vrot.lane.b32.xlu0 %v5594_v29, %s5125_s2 }
 0xd63   :  { %2380 = vrot.lane.b32.xlu1 %v5594_v29, %s5126_s16 }
 0xd64   :  { %2384 = vrot.lane.b32.xlu0 %v5594_v29, %s5127_s1 }
 0xd67   :  { %2382 = vrot.lane.b32.xlu1 %v5592_v63, %s5126_s16 }
 0xd68   :  { %2388 = vrot.lane.b32.xlu0 %v5594_v29, %s5128_s17 }
 0xd6b   :  { %2386 = vrot.lane.b32.xlu1 %v5592_v63, %s5127_s1 }
 0xd6f   :  { %2464 = vrot.lane.b32.xlu1 %v5592_v63, %s5128_s17 }
 0xdd1   :  { %v5612_v32 = vpop.permute.xlu1 %2378 }
 0xdd2   :  { %2616 = vrot.lane.b32.xlu1 %v5612_v32, %s5128_s17  ;;  %v5616_v1 = vpop.permute.xlu0 %2376 }
 0xdd3   :  { %2540 = vrot.lane.b32.xlu0 %v5616_v1, %s5128_s17 }
 0xdd5   :  { %v5620_v2 = vpop.permute.xlu1 %2380 }
 0xdd6   :  { %v5622_v3 = vpop.permute.xlu0 %2384 }
 0xdd7   :  { %2692 = vrot.lane.b32.xlu0 %v5620_v2, %s5128_s17 }
 0xdd9   :  { %v5626_v4 = vpop.permute.xlu1 %2382 }
 0xdda   :  { %2768 = vrot.lane.b32.xlu1 %v5626_v4, %s5128_s17  ;;  %v2389_v7 = vpop.permute.xlu0 %2388 }
 0xddb   :  { %2844 = vrot.lane.b32.xlu0 %v5622_v3, %s5128_s17  ;;  %4738 = vmatpush3.xpose.msk.msra.mxu0 %vm305_vm10, %v2389_v7 }
 0xddc   :  { %4747 = vmatprep.subr.mxu0 %v5123_v21 }
 0xddd   :  { %v5634_v8 = vpop.permute.xlu1 %2386 }
 0xdde   :  { %2920 = vrot.lane.b32.xlu1 %v5634_v8, %s5128_s17  ;;  %4740 = vmatmul.mubr.msk.f32.vlgmr.msra.gmra.mrb[26].mxu0 %vm305_vm10, %v5594_v29 }
 0xddf   :  { %4749 = vmatprep.mubr.msk.f32.mxu0 %vm5124_vm9, %v5123_v21 }
 0xde1   :  { %v2465_v9 = vpop.permute.xlu1 %2464 }
 0xde2   :  { %4743 = vmatpush3.xpose.msk.msra.mxu1 %vm305_vm10, %v2465_v9 }
 0xde3   :  { %4752 = vmatprep.subr.mxu1 %v5123_v21 }
 0xde5   :  { %4745 = vmatmul.mubr.msk.f32.vlgmr.msra.gmra.mrb[22].mxu1 %vm305_vm10, %v5592_v63 }
 0xde6   :  { %4754 = vmatprep.mubr.msk.f32.mxu1 %vm5124_vm9, %v5123_v21 }
 0xe44   :  { %v2617_v10 = vpop.permute.xlu1 %2616 }
 0xe45   :  { %4753 = vmatpush3.xpose.msk.msra.mxu1 %vm305_vm10, %v2617_v10  ;;  %v2541_v11 = vpop.permute.xlu0 %2540 }
 0xe46   :  { %4748 = vmatpush3.xpose.msk.msra.mxu0 %vm305_vm10, %v2541_v11  ;;  %4762 = vmatprep.subr.mxu1 %v5123_v21 }
 0xe47   :  { %4757 = vmatprep.subr.mxu0 %v5123_v21 }
 0xe48   :  { %4755 = vmatmul.mubr.msk.f32.vlgmr.msra.gmra.mrb[24].mxu1 %vm305_vm10, %v5612_v32 }
 0xe49   :  { %4750 = vmatmul.mubr.msk.f32.vlgmr.msra.gmra.mrb[28].mxu0 %vm305_vm10, %v5616_v1  ;;  %v2693_v12 = vpop.permute.xlu0 %2692  ;;  %4764 = vmatprep.mubr.msk.f32.mxu1 %vm5124_vm9, %v5123_v21 }
 0xe4a   :  { %4758 = vmatpush3.xpose.msk.msra.mxu0 %vm305_vm10, %v2693_v12  ;;  %4759 = vmatprep.mubr.msk.f32.mxu0 %vm5124_vm9, %v5123_v21 }
 0xe4b   :  { %4767 = vmatprep.subr.mxu0 %v5123_v21 }
 0xe4c   :  { %v2769_v13 = vpop.permute.xlu1 %2768 }
 0xe4d   :  { %4760 = vmatmul.mubr.msk.f32.vlgmr.msra.gmra.mrb[30].mxu0 %vm305_vm10, %v5620_v2  ;;  %4763 = vmatpush3.xpose.msk.msra.mxu1 %vm305_vm10, %v2769_v13  ;;  %v2845_v36 = vpop.permute.xlu0 %2844 }
 0xe4e   :  { %4768 = vmatpush3.xpose.msk.msra.mxu0 %vm305_vm10, %v2845_v36  ;;  %4772 = vmatprep.subr.mxu1 %v5123_v21 }
 0xe4f   :  { %4769 = vmatprep.mubr.msk.f32.mxu0 %vm5124_vm9, %v5123_v21  ;;  %4777 = vmatprep.subr.mxu0 %v5123_v21 }
 0xe50   :  { %4765 = vmatmul.mubr.msk.f32.vlgmr.msra.gmra.mrb[26].mxu1 %vm305_vm10, %v5626_v4  ;;  %v2921_v15 = vpop.permute.xlu1 %2920 }
 0xe51   :  { %4770 = vmatmul.mubr.msk.f32.vlgmr.msra.gmra.mrb[32].mxu0 %vm305_vm10, %v5622_v3  ;;  %4773 = vmatpush3.xpose.msk.msra.mxu1 %vm305_vm10, %v2921_v15 }
 0xe52   :  { %4774 = vmatprep.mubr.msk.f32.mxu1 %vm5124_vm9, %v5123_v21  ;;  %4782 = vmatprep.subr.mxu1 %v5123_v21 }
 0xe53   :  { %4779 = vmatprep.mubr.msk.f32.mxu0 %vm5124_vm9, %v5123_v21 }
 0xe54   :  { %4775 = vmatmul.mubr.msk.f32.vlgmr.msra.gmra.mrb[28].mxu1 %vm305_vm10, %v5634_v8 }
 0xe55   :  { %4784 = vmatprep.mubr.msk.f32.mxu1 %vm5124_vm9, %v5123_v21 }
 0xeb1   :  { %v2460_v16 = vpop.f32.mrb[26].mxu0 }
 0xeb2   :  { %v2996_v17 = vmul.f32 0.35355338, %v2460_v16  ;;  %v4741_v18 = vpop.f32.mrb[27].mxu0 }
 0xeb4   :  { %v3004_v19 = vsel %vm305_vm10, %v2996_v17, -inf }
 0xeb5   :  { %3005 = vmax.xlane.f32.xlu0 %v3004_v19 }
 0xeb8   :  { %v2536_v20 = vpop.f32.mrb[22].mxu1 }
 0xeb9   :  { %v2997_v5 = vmul.f32 0.35355338, %v2536_v20  ;;  %v4746_v22 = vpop.f32.mrb[23].mxu1 }
 0xebb   :  { %v3007_v23 = vsel %vm305_vm10, %v2997_v5, -inf }
 0xebc   :  { %3008 = vmax.xlane.f32.xlu1 %v3007_v23 }
 0xf1b   :  { %v2688_v6 = vpop.f32.mrb[24].mxu1 }
 0xf1c   :  { %v2999_v24 = vmul.f32 0.35355338, %v2688_v6  ;;  %v2612_v25 = vpop.f32.mrb[28].mxu0  ;;  %v4756_v26 = vpop.f32.mrb[25].mxu1 }
 0xf1d   :  { %v4751_v27 = vpop.f32.mrb[29].mxu0  ;;  %v2998_v28 = vmul.f32 0.35355338, %v2612_v25 }
 0xf1e   :  { %v3013_v30 = vsel %vm305_vm10, %v2999_v24, -inf }
 0xf1f   :  { %3014 = vmax.xlane.f32.xlu0 %v3013_v30  ;;  %v3010_v35 = vsel %vm305_vm10, %v2998_v28, -inf }
 0xf20   :  { %v2764_v31 = vpop.f32.mrb[30].mxu0 }
 0xf21   :  { %v4761_v33 = vpop.f32.mrb[31].mxu0  ;;  %v3000_v34 = vmul.f32 0.35355338, %v2764_v31 }
 0xf23   :  { %v2840_v37 = vpop.f32.mrb[26].mxu1  ;;  %3011 = vmax.xlane.f32.xlu0 %v3010_v35  ;;  %v3016_v45 = vsel %vm305_vm10, %v3000_v34, -inf }
 0xf24   :  { %v3001_v38 = vmul.f32 0.35355338, %v2840_v37  ;;  %v4766_v39 = vpop.f32.mrb[27].mxu1  ;;  %v2916_v41 = vpop.f32.mrb[32].mxu0 }
 0xf25   :  { %v4771_v42 = vpop.f32.mrb[33].mxu0  ;;  %v3002_v43 = vmul.f32 0.35355338, %v2916_v41 }
 0xf26   :  { %v3019_v44 = vsel %vm305_vm10, %v3001_v38, -inf }
 0xf27   :  { %3020 = vmax.xlane.f32.xlu1 %v3019_v44  ;;  %v2992_v46 = vpop.f32.mrb[28].mxu1  ;;  %3017 = vmax.xlane.f32.xlu0 %v3016_v45  ;;  %v3022_v50 = vsel %vm305_vm10, %v3002_v43, -inf }
 0xf28   :  { %v3003_v47 = vmul.f32 0.35355338, %v2992_v46  ;;  %v4776_v48 = vpop.f32.mrb[29].mxu1 }
 0xf2a   :  { %v3025_v49 = vsel %vm305_vm10, %v3003_v47, -inf }
 0xf2b   :  { %3026 = vmax.xlane.f32.xlu1 %v3025_v49  ;;  %3023 = vmax.xlane.f32.xlu0 %v3022_v50 }
 0xf3c   :  { %3168 = vrot.lane.b32.xlu1 %v5592_v63, %s5129_s18 }
 0xf40   :  { %3244 = vrot.lane.b32.xlu1 %v5616_v1, %s5129_s18 }
 0xf41   :  { %3092 = vrot.lane.b32.xlu0 %v5594_v29, %s5129_s18 }
 0xf42   :  { %v3006_v51 = vpop.xlane.xlu0 %3005 }
 0xf43   :  { %v3028_v52 = vsub.f32 %v2996_v17, %v3006_v51 }
 0xf44   :  { %3320 = vrot.lane.b32.xlu1 %v5612_v32, %s5129_s18 }
 0xf45   :  { %3396 = vrot.lane.b32.xlu0 %v5620_v2, %s5129_s18  ;;  %v3036_v53 = vmul.f32 1.442695, %v3028_v52 }
 0xf47   :  { %5007 = vpow2.f32 %v3036_v53 }
 0xf48   :  { %3472 = vrot.lane.b32.xlu1 %v5626_v4, %s5129_s18 }
 0xf49   :  { %v3009_v54 = vpop.xlane.xlu1 %3008 }
 0xf4a   :  { %v3029_v55 = vsub.f32 %v2997_v5, %v3009_v54 }
 0xf4c   :  { %v3038_v56 = vmul.f32 1.442695, %v3029_v55 }
 0xf4e   :  { %5009 = vpow2.f32 %v3038_v56 }
 0xf51   :  { %v5704_v57 = vpop.eup %5007 }
 0xf52   :  { %v3052_v58 = vsel %vm305_vm10, %v5704_v57, 0.0 }
 0xf58   :  { %v5708_v59 = vpop.eup %5009 }
 0xf59   :  { %v3055_v60 = vsel %vm305_vm10, %v5708_v59, 0.0 }
 0xf64   :  { %3053 = vadd.xlane.f32.xlu0 %v3052_v58 }
 0xf6c   :  { %3056 = vadd.xlane.f32.xlu1 %v3055_v60 }
 0xfac   :  { %v3015_v61 = vpop.xlane.xlu0 %3014 }
 0xfad   :  { %v3031_v62 = vsub.f32 %v2999_v24, %v3015_v61 }
 0xfaf   :  { %v3042_v63 = vmul.f32 1.442695, %v3031_v62 }
 0xfb0   :  { %v3012_v0 = vpop.xlane.xlu0 %3011 }
 0xfb1   :  { %5011 = vpow2.f32 %v3042_v63  ;;  %v3030_v29 = vsub.f32 %v2998_v28, %v3012_v0  ;;  %v4416_v63 = vld [vmem:[%s5881_s7 + $0x28] sm:$0xff]  ;;  %v4417_v0 = vld [vmem:[%s5881_s7 + $0x30] sm:$0xff] }
 0xfb3   :  { %v3040_v32 = vmul.f32 1.442695, %v3030_v29 }
 0xfb4   :  { %v3021_v1 = vpop.xlane.xlu1 %3020  ;;  %v3018_v2 = vpop.xlane.xlu0 %3017 }
 0xfb5   :  { %5013 = vpow2.f32 %v3040_v32  ;;  %v3033_v4 = vsub.f32 %v3001_v38, %v3021_v1  ;;  %v3032_v7 = vsub.f32 %v3000_v34, %v3018_v2 }
 0xfb7   :  { %v3046_v9 = vmul.f32 1.442695, %v3033_v4  ;;  %v3044_v10 = vmul.f32 1.442695, %v3032_v7 }
 0xfb8   :  { %v3027_v11 = vpop.xlane.xlu1 %3026  ;;  %v3024_v12 = vpop.xlane.xlu0 %3023 }
 0xfb9   :  { %5015 = vpow2.f32 %v3046_v9  ;;  %v3035_v13 = vsub.f32 %v3003_v47, %v3027_v11  ;;  %v3034_v36 = vsub.f32 %v3002_v43, %v3024_v12 }
 0xfba   :  { %5017 = vpow2.f32 %v3044_v10 }
 0xfbb   :  { %v5012_v15 = vpop.eup %5011  ;;  %v3050_v16 = vmul.f32 1.442695, %v3035_v13  ;;  %v3048_v17 = vmul.f32 1.442695, %v3034_v36 }
 0xfbc   :  { %v3169_v18 = vpop.permute.xlu1 %3168  ;;  %v3093_v19 = vpop.permute.xlu0 %3092  ;;  %v3061_v20 = vsel %vm305_vm10, %v5012_v15, 0.0 }
 0xfbd   :  { %5019 = vpow2.f32 %v3050_v16  ;;  %4783 = vmatpush3.msra.mxu1 %v3169_v18  ;;  %3062 = vadd.xlane.f32.xlu1 %v3061_v20 }
 0xfbe   :  { %5021 = vpow2.f32 %v3048_v17  ;;  %4778 = vmatpush3.msra.mxu0 %v3093_v19  ;;  %4792 = vmatprep.subr.mxu1 %v5123_v21 }
 0xfbf   :  { %v5014_v5 = vpop.eup %5013  ;;  %4787 = vmatprep.subr.mxu0 %v5123_v21 }
 0xfc0   :  { %v3058_v22 = vsel %vm305_vm10, %v5014_v5, 0.0  ;;  %v3245_v31 = vpop.permute.xlu1 %3244  ;;  %v3397_v33 = vpop.permute.xlu0 %3396 }
 0xfc1   :  { %3059 = vadd.xlane.f32.xlu0 %v3058_v22 }
 0xfc3   :  { %v5016_v23 = vpop.eup %5015 }
 0xfc4   :  { %v5018_v6 = vpop.eup %5017  ;;  %v3067_v24 = vsel %vm305_vm10, %v5016_v23, 0.0  ;;  %v3321_v34 = vpop.permute.xlu1 %3320 }
 0xfc5   :  { %3068 = vadd.xlane.f32.xlu1 %v3067_v24  ;;  %v3064_v25 = vsel %vm305_vm10, %v5018_v6, 0.0 }
 0xfc6   :  { %3065 = vadd.xlane.f32.xlu0 %v3064_v25 }
 0xfc7   :  { %v5718_v26 = vpop.eup %5019 }
 0xfc8   :  { %v5720_v27 = vpop.eup %5021  ;;  %v3073_v28 = vsel %vm305_vm10, %v5718_v26, 0.0  ;;  %v3473_v37 = vpop.permute.xlu1 %3472 }
 0xfc9   :  { %3074 = vadd.xlane.f32.xlu1 %v3073_v28  ;;  %v3070_v30 = vsel %vm305_vm10, %v5720_v27, 0.0 }
 0xfca   :  { %3071 = vadd.xlane.f32.xlu0 %v3070_v30 }
 0xfda   :  { %3624 = vrot.lane.b32.xlu1 %v5634_v8, %s5129_s18 }
 0xfe0   :  { %3548 = vrot.lane.b32.xlu0 %v5622_v3, %s5129_s18 }
 0xff1   :  { %v3054_v35 = vpop.xlane.xlu0 %3053 }
 0xff2   :  { %5023 = vrcp.f32 %v3054_v35 }
 0xff9   :  { %v3057_v38 = vpop.xlane.xlu1 %3056 }
 0xffa   :  { %5025 = vrcp.f32 %v3057_v38 }
 0xffc   :  { %v5024_v39 = vpop.eup %5023 }
 0xffd   :  { %v3084_v41 = vmul.f32 %v5024_v39, %v5704_v57  ;;  %v4415_v57 = vld [vmem:[%s5881_s7 + $0x20] sm:$0xff] }
 0xffe   :  { %v4428_v39 = vld [vmem:[%s5882_s8 + $0x1] ss:$0 sm:$0xff] }
 0xfff   :  { %4780 = vmatmul.mubr.msk.f32.vlgmr.msra.gmra.mrb[34].mxu0 %vm305_vm10, %v3084_v41 }
0x1000   :  { %4788 = vmatpush3.msra.mxu0 %v3245_v31  ;;  %4789 = vmatprep.mubr.msk.f32.mxu0 %vm5124_vm9, %v5123_v21 }
0x1001   :  { %4797 = vmatprep.subr.mxu0 %v5123_v21 }
0x1004   :  { %v5026_v3 = vpop.eup %5025 }
0x1005   :  { %v3085_v8 = vmul.f32 %v5026_v3, %v5708_v59 }
0x1007   :  { %4785 = vmatmul.mubr.msk.f32.vlgmr.msra.gmra.mrb[30].mxu1 %vm305_vm10, %v3085_v8 }
0x1008   :  { %4793 = vmatpush3.msra.mxu1 %v3321_v34  ;;  %4794 = vmatprep.mubr.msk.f32.mxu1 %vm5124_vm9, %v5123_v21 }
0x1009   :  { %4802 = vmatprep.subr.mxu1 %v5123_v21 }
0x104a   :  { %v3063_v42 = vpop.xlane.xlu1 %3062 }
0x104b   :  { %5027 = vrcp.f32 %v3063_v42 }
0x104e   :  { %v3060_v43 = vpop.xlane.xlu0 %3059 }
0x104f   :  { %5029 = vrcp.f32 %v3060_v43 }
0x1052   :  { %v3069_v44 = vpop.xlane.xlu1 %3068 }
0x1053   :  { %5031 = vrcp.f32 %v3069_v44  ;;  %v3066_v45 = vpop.xlane.xlu0 %3065 }
0x1054   :  { %5033 = vrcp.f32 %v3066_v45 }
0x1055   :  { %v5028_v46 = vpop.eup %5027 }
0x1056   :  { %v3087_v47 = vmul.f32 %v5028_v46, %v5012_v15  ;;  %v3075_v48 = vpop.xlane.xlu1 %3074 }
0x1057   :  { %5035 = vrcp.f32 %v3075_v48  ;;  %v3072_v49 = vpop.xlane.xlu0 %3071 }
0x1058   :  { %5037 = vrcp.f32 %v3072_v49  ;;  %4795 = vmatmul.mubr.msk.f32.vlgmr.msra.gmra.mrb[32].mxu1 %vm305_vm10, %v3087_v47 }
0x1059   :  { %v5030_v50 = vpop.eup %5029  ;;  %4803 = vmatpush3.msra.mxu1 %v3473_v37  ;;  %4804 = vmatprep.mubr.msk.f32.mxu1 %vm5124_vm9, %v5123_v21 }
0x105a   :  { %v3086_v51 = vmul.f32 %v5030_v50, %v5014_v5  ;;  %4812 = vmatprep.subr.mxu1 %v5123_v21  ;;  %v3625_v56 = vpop.permute.xlu1 %3624 }
0x105b   :  { %v3549_v59 = vpop.permute.xlu0 %3548 }
0x105c   :  { %4790 = vmatmul.mubr.msk.f32.vlgmr.msra.gmra.mrb[36].mxu0 %vm305_vm10, %v3086_v51 }
0x105d   :  { %v5032_v52 = vpop.eup %5031  ;;  %4798 = vmatpush3.msra.mxu0 %v3397_v33  ;;  %4799 = vmatprep.mubr.msk.f32.mxu0 %vm5124_vm9, %v5123_v21 }
0x105e   :  { %v5034_v53 = vpop.eup %5033  ;;  %v3089_v54 = vmul.f32 %v5032_v52, %v5016_v23  ;;  %4807 = vmatprep.subr.mxu0 %v5123_v21 }
0x105f   :  { %v3088_v55 = vmul.f32 %v5034_v53, %v5018_v6 }
0x1060   :  { %4805 = vmatmul.mubr.msk.f32.vlgmr.msra.gmra.mrb[34].mxu1 %vm305_vm10, %v3089_v54 }
0x1061   :  { %v5036_v58 = vpop.eup %5035  ;;  %4800 = vmatmul.mubr.msk.f32.vlgmr.msra.gmra.mrb[38].mxu0 %vm305_vm10, %v3088_v55  ;;  %4813 = vmatpush3.msra.mxu1 %v3625_v56 }
0x1062   :  { %v5038_v60 = vpop.eup %5037  ;;  %v3091_v61 = vmul.f32 %v5036_v58, %v5718_v26  ;;  %4808 = vmatpush3.msra.mxu0 %v3549_v59  ;;  %4809 = vmatprep.mubr.msk.f32.mxu0 %vm5124_vm9, %v5123_v21  ;;  %v4434_v58 = vld [vmem:[%s5885_s11 + $0x28] sm:$0xff]  ;;  %v4435_v59 = vld [vmem:[%s5885_s11 + $0x30] sm:$0xff] }
0x1063   :  { %v3090_v62 = vmul.f32 %v5038_v60, %v5720_v27  ;;  %4814 = vmatprep.mubr.msk.f32.mxu1 %vm5124_vm9, %v5123_v21  ;;  %4817 = vmatprep.subr.mxu0 %v4415_v57  ;;  %v4418_v21 = vld [vmem:[%s5881_s7 + $0x38] sm:$0xff] }
0x1064   :  { %4815 = vmatmul.mubr.msk.f32.vlgmr.msra.gmra.mrb[36].mxu1 %vm305_vm10, %v3091_v61  ;;  %4822 = vmatprep.subr.mxu1 %v4416_v63  ;;  %v4436_v61 = vld [vmem:[%s5885_s11 + $0x38] sm:$0xff] }
0x1065   :  { %4810 = vmatmul.mubr.msk.f32.vlgmr.msra.gmra.mrb[40].mxu0 %vm305_vm10, %v3090_v62  ;;  %4823 = vmatpush3.msra.mxu1 %v4416_v63  ;;  %v4911_v62 = vpack.c.bf16 %v4436_v61, %v4435_v59  ;;  %v4441_v63 = vld [vmem:[%s5887_s13 + $0x40] sm:$0xff] }
0x1066   :  { %4818 = vmatpush3.msra.mxu0 %v4415_v57  ;;  %4832 = vmatprep.subr.mxu1 %v4418_v21  ;;  %v4433_v57 = vld [vmem:[%s5885_s11 + $0x20] sm:$0xff] }
0x1067   :  { %4827 = vmatprep.subr.mxu0 %v4417_v0  ;;  %v4907_v60 = vpack.c.bf16 %v4434_v58, %v4433_v57 }
0x10d2   :  { %v3164_v29 = vpop.f32.mrb[34].mxu0 }
0x10d3   :  { %v4781_v32 = vpop.f32.mrb[35].mxu0  ;;  %4819 = vmatprep.mubr.msk.f32.mxu0 %vm305_vm10, %v3164_v29 }
0x10d4   :  { %v4444_v32 = vld [vmem:[%s5887_s13 + $0x58] sm:$0xff] }
0x10da   :  { %v3240_v1 = vpop.f32.mrb[30].mxu1 }
0x10db   :  { %v4786_v2 = vpop.f32.mrb[31].mxu1  ;;  %4820 = vmatmul.mubr.msk.f32.vlgmr.msra.gmra.mrb[42].mxu0 %vm305_vm10, %v3240_v1 }
0x10dc   :  { %4828 = vmatpush3.msra.mxu0 %v4417_v0  ;;  %v4442_v0 = vld [vmem:[%s5887_s13 + $0x48] sm:$0xff]  ;;  %v4445_v2 = vld [vmem:[%s5887_s13 + $0x60] sm:$0xff] }
0x10dd   :  { %4908 = vmatprep.subr.bf16.mxu0 %v4907_v60  ;;  %v4915_v29 = vpack.c.bf16 %v4442_v0, %v4441_v63 }
0x112b   :  { %v3392_v4 = vpop.f32.mrb[32].mxu1 }
0x112c   :  { %v4796_v7 = vpop.f32.mrb[33].mxu1 }
0x112f   :  { %v3316_v9 = vpop.f32.mrb[36].mxu0 }
0x1130   :  { %v4791_v10 = vpop.f32.mrb[37].mxu0  ;;  %4824 = vmatprep.mubr.msk.f32.mxu1 %vm305_vm10, %v3316_v9 }
0x1131   :  { %4825 = vmatmul.mubr.msk.f32.vlgmr.msra.gmra.mrb[38].mxu1 %vm305_vm10, %v3392_v4  ;;  %v4446_v4 = vld [vmem:[%s5887_s13 + $0x68] sm:$0xff] }
0x1132   :  { %4833 = vmatpush3.msra.mxu1 %v4418_v21  ;;  %v4443_v21 = vld [vmem:[%s5887_s13 + $0x50] sm:$0xff]  ;;  %v4923_v7 = vpack.c.bf16 %v4446_v4, %v4445_v2 }
0x1133   :  { %v3544_v11 = vpop.f32.mrb[34].mxu1  ;;  %v4919_v1 = vpack.c.bf16 %v4444_v32, %v4443_v21  ;;  %4916 = vmatprep.subr.bf16.mxu1 %v4915_v29 }
0x1134   :  { %v3468_v12 = vpop.f32.mrb[38].mxu0  ;;  %v4806_v13 = vpop.f32.mrb[35].mxu1 }
0x1135   :  { %v4801_v36 = vpop.f32.mrb[39].mxu0  ;;  %4829 = vmatprep.mubr.msk.f32.mxu0 %vm305_vm10, %v3468_v12 }
0x1136   :  { %4830 = vmatmul.mubr.msk.f32.vlgmr.msra.gmra.mrb[44].mxu0 %vm305_vm10, %v3544_v11 }
0x1137   :  { %v3696_v15 = vpop.f32.mrb[36].mxu1  ;;  %4910 = vmatpush3.bf16.msra.mxu0 %v4907_v60 }
0x1138   :  { %v3620_v16 = vpop.f32.mrb[40].mxu0  ;;  %v4816_v17 = vpop.f32.mrb[37].mxu1  ;;  %4912 = vmatprep.subr.bf16.mxu0 %v4911_v62 }
0x1139   :  { %v4811_v18 = vpop.f32.mrb[41].mxu0  ;;  %4834 = vmatprep.mubr.msk.f32.mxu1 %vm305_vm10, %v3620_v16 }
0x113a   :  { %4835 = vmatmul.mubr.msk.f32.vlgmr.msra.gmra.mrb[40].mxu1 %vm305_vm10, %v3696_v15 }
0x113b   :  { %4914 = vmatpush3.bf16.msra.mxu0 %v4911_v62  ;;  %4918 = vmatpush3.bf16.msra.mxu1 %v4915_v29 }
0x113c   :  { %4920 = vmatprep.subr.bf16.mxu1 %v4919_v1 }
0x113f   :  { %4922 = vmatpush3.bf16.msra.mxu1 %v4919_v1 }
0x1140   :  { %4924 = vmatprep.subr.bf16.mxu1 %v4923_v7 }
0x1143   :  { %4926 = vmatpush3.bf16.msra.mxu1 %v4923_v7 }
0x11ae   :  { %v4821_v19 = vpop.f32.mrb[42].mxu0 }
0x11af   :  { %v3777_v20 = vpop.f32.mrb[43].mxu0  ;;  %v4036_v22 = vsel %vm81_vm0, %v4821_v19, 0.0 }
0x11b0   :  { %v4029_v24 = vsel %vm81_vm0, %v3777_v20, 0.0 }
0x1204   :  { %v4826_v5 = vpop.f32.mrb[38].mxu1 }
0x1205   :  { %v4037_v23 = vsel %vm81_vm0, %v4826_v5, 0.0  ;;  %v3858_v6 = vpop.f32.mrb[39].mxu1 }
0x1206   :  { %v4038_v25 = vadd.f32 %v4037_v23, %v4036_v22  ;;  %v4030_v26 = vsel %vm81_vm0, %v3858_v6, 0.0 }
0x1207   :  { %v4031_v27 = vadd.f32 %v4030_v26, %v4029_v24  ;;  %v4431_v24 = vld [vmem:[%s5883_s9 + $0x1] ss:$0 sm:$0xff] }
0x1209   :  { %v4831_v28 = vpop.f32.mrb[44].mxu0 }
0x120a   :  { %v4039_v30 = vsel %vm81_vm0, %v4831_v28, 0.0  ;;  %v3939_v31 = vpop.f32.mrb[45].mxu0 }
0x120b   :  { %v4040_v33 = vadd.f32 %v4039_v30, %v4038_v25  ;;  %v4032_v34 = vsel %vm81_vm0, %v3939_v31, 0.0 }
0x120c   :  { %v4033_v35 = vadd.f32 %v4032_v34, %v4031_v27  ;;  %v4432_v27 = vld [vmem:[%s5884_s10 + $0x1] ss:$0 sm:$0xff] }
0x120d   :  { %v4836_v37 = vpop.f32.mrb[40].mxu1 }
0x120e   :  { %v4041_v38 = vsel %vm81_vm0, %v4836_v37, 0.0  ;;  %v4020_v41 = vpop.f32.mrb[41].mxu1  ;;  %v4447_v37 = vld [vmem:[%s5887_s13 + $0x70] sm:$0xff] }
0x120f   :  { %v4042_v3 = vadd.f32 %v4041_v38, %v4040_v33  ;;  %v4034_v8 = vsel %vm81_vm0, %v4020_v41, 0.0  ;;  %v4448_v38 = vld [vmem:[%s5887_s13 + $0x78] sm:$0xff]  ;;  %v4438_v41 = vld [vmem:[%s5886_s12 + $0x1] ss:$0 sm:$0xff]  ;;  %s5130_s13 = smov [#allocation7]  }
0x1210   :  { %v4035_v42 = vadd.f32 %v4034_v8, %v4033_v35  ;;  %s4318_s26 = sshll.u32 %s5130_s13, 4  ;;  %s4319_s26 = int_to_ptr.vmem [resolvable:$true] %s4318_s26 }
0x1211   :  { %v4052_v43 = vadd.f32 %v4428_v39, %v4042_v3  ;;  %s5091_s12 = scalar_lea.vmem %s4319_s26, 256  ;;  %p5096_p3 = scmp.lt.s32.totalorder %s4319_s26, %s4319_s26 }
0x1212   :  { %v4051_v44 = vadd.f32 %v4428_v39, %v4035_v42  ;;  %v4927_v39 = vpack.c.bf16 %v4448_v38, %v4447_v37  ;;  %p5092_p2 = scmp.ne.s32.totalorder %s4319_s26, %s5091_s12  ;;  %p5097_p4 = scmp.lt.s32.totalorder %s5091_s12, %s5091_s12 }
0x1213   :  { %v5790_v45 = vadd.f32 %v4052_v43, %v5553_v40 }
0x1214   :  { %v5793_v46 = vadd.f32 %v4051_v44, %v5556_v14  ;;  %4928 = vmatprep.subr.bf16.mxu1 %v4927_v39  ;;  %p5098_p5 = por %p5097_p4, %p5096_p3 }
0x1215   :  { %v4062_v47 = vsel %vm81_vm0, %v5790_v45, 0.0  ;;  %4930 = vmatpush3.bf16.msra.mxu1 %v4927_v39 }
0x1216   :  { %4063 = vadd.xlane.f32.xlu1 %v4062_v47  ;;  %v4059_v48 = vsel %vm81_vm0, %v5793_v46, 0.0  ;;  %p5099_p6 = pnand %p5098_p5, %p5092_p2 }
0x1217   :  { %4060 = vadd.xlane.f32.xlu0 %v4059_v48  ;;  %v4450_v48 = vld [vmem:[%s5888_s14 + $0x1] ss:$0 sm:$0xff] }
0x12a3   :  { %v4064_v49 = vpop.xlane.xlu1 %4063 }
0x12a4   :  { %v4066_v50 = vmul.f32 0.03125, %v4064_v49  ;;  %v4061_v51 = vpop.xlane.xlu0 %4060 }
0x12a5   :  { %v4065_v52 = vmul.f32 0.03125, %v4061_v51 }
0x12a6   :  { %v4068_v53 = vsub.f32 %v5790_v45, %v4066_v50 }
0x12a7   :  { %v4067_v40 = vsub.f32 %v5793_v46, %v4065_v52 }
0x12a8   :  { %v4070_v55 = vmul.f32 %v4068_v53, %v4068_v53  ;;  %v4100_v30 = vmul.f32 %v4431_v24, %v4068_v53 }
0x12a9   :  { %v4069_v54 = vmul.f32 %v4067_v40, %v4067_v40  ;;  %v4099_v25 = vmul.f32 %v4431_v24, %v4067_v40 }
0x12aa   :  { %v4074_v56 = vsel %vm81_vm0, %v4070_v55, 0.0 }
0x12ab   :  { %v4071_v14 = vsel %vm81_vm0, %v4069_v54, 0.0 }
0x12ac   :  { %4072 = vadd.xlane.f32.xlu0 %v4071_v14 }
0x12b0   :  { %4075 = vadd.xlane.f32.xlu0 %v4074_v56 }
0x1339   :  { %v4073_v9 = vpop.xlane.xlu0 %4072 }
0x133a   :  { %v4077_v10 = vmul.f32 0.032258064, %v4073_v9 }
0x133c   :  { %5039 = vrsqrt.f32 %v4077_v10  ;;  %vm4081_vm5 = vcmp.eq.f32.partialorder %v4077_v10, inf  ;;  %v4084_v15 = vand.u32 2147483648, %v4077_v10  ;;  %vm4083_vm6 = vcmp.eq.f32.partialorder %v4077_v10, 0.0 }
0x133d   :  { %v4076_v11 = vpop.xlane.xlu0 %4075 }
0x133e   :  { %v4078_v12 = vmul.f32 0.032258064, %v4076_v11 }
0x1340   :  { %5041 = vrsqrt.f32 %v4078_v12  ;;  %vm4088_vm7 = vcmp.eq.f32.partialorder %v4078_v12, inf  ;;  %v4091_v5 = vand.u32 2147483648, %v4078_v12  ;;  %vm4090_vm8 = vcmp.eq.f32.partialorder %v4078_v12, 0.0 }
0x1346   :  { %v5040_v13 = vpop.eup %5039 }
0x1347   :  { %v4080_v36 = vmul.f32 %v5040_v13, %v4077_v10 }
0x1349   :  { %v4082_v16 = vsel %vm4081_vm5, %v4077_v10, %v4080_v36 }
0x134a   :  { %v5042_v17 = vpop.eup %5041  ;;  %v4085_v18 = vsel %vm4083_vm6, %v4084_v15, %v4082_v16 }
0x134b   :  { %v4087_v19 = vmul.f32 %v5042_v17, %v4078_v12  ;;  %v4101_v20 = vadd.f32 1e-06, %v4085_v18 }
0x134d   :  { %v4089_v22 = vsel %vm4088_vm7, %v4078_v12, %v4087_v19  ;;  %5043 = vrcp.f32 %v4101_v20 }
0x134e   :  { %v4092_v23 = vsel %vm4090_vm8, %v4091_v5, %v4089_v22 }
0x134f   :  { %v4102_v6 = vadd.f32 1e-06, %v4092_v23 }
0x1351   :  { %5045 = vrcp.f32 %v4102_v6 }
0x1357   :  { %v5044_v26 = vpop.eup %5043 }
0x1358   :  { %v4104_v28 = vmul.f32 %v5044_v26, %v4099_v25 }
0x135a   :  { %v4113_v31 = vadd.f32 %v4432_v27, %v4104_v28 }
0x135b   :  { %v5046_v33 = vpop.eup %5045 }
0x135c   :  { %v4106_v34 = vmul.f32 %v5046_v33, %v4100_v30  ;;  %4845 = vmatprep.mubr.msk.f32.mxu0 %vm81_vm0, %v4113_v31 }
0x135e   :  { %v4114_v35 = vadd.f32 %v4432_v27, %v4106_v34 }
0x1360   :  { %4846 = vmatmul.mubr.msk.f32.vlgmr.msra.gmra.mrb[46].mxu0 %vm81_vm0, %v4114_v35 }
0x1433   :  { %v4847_v3 = vpop.f32.mrb[46].mxu0 }
0x1434   :  { %v4206_v8 = vadd.f32 %v4847_v3, %v4438_v41  ;;  %v4200_v42 = vpop.f32.mrb[47].mxu0 }
0x1435   :  { %v4201_v43 = vadd.f32 %v4438_v41, %v4200_v42 }
0x1436   :  { %v4210_v47 = vmax.f32 %v4206_v8, 0.0 }
0x1437   :  { %v4209_v44 = vmax.f32 %v4201_v43, 0.0 }
0x1439   :  { %4864 = vmatprep.mubr.msk.f32.mxu1 %vm2136_vm15, %v4209_v44 }
0x143a   :  { %4865 = vmatmul.mubr.msk.f32.vlgmr.msra.gmra.mrb[42].mxu1 %vm2136_vm15, %v4210_v47 }
0x150d   :  { %v4866_v49 = vpop.f32.mrb[42].mxu1 }
0x150e   :  { %v4306_v50 = vadd.f32 %v4866_v49, %v4450_v48  ;;  %v4300_v51 = vpop.f32.mrb[43].mxu1 }
0x150f   :  { %v4301_v52 = vadd.f32 %v4450_v48, %v4300_v51 }
0x1510   :  { %v4310_v53 = vadd.f32 %v4306_v50, %v5790_v45 }
0x1511   :  { %v4309_v40 = vadd.f32 %v4301_v52, %v5793_v46 }
0x1512   :  { %4312 = vst.msk [vmem:[#allocation7 + $0x8] sm:$0xff] %vm81_vm0, %v4310_v53 }
0x1513   :  { %4311 = vst.msk [vmem:[#allocation7] sm:$0xff] %vm81_vm0, %v4309_v40 }
0x1514   :  { %5102 = shalt.err (!%p5099_p6)
}
0x1515   :  { %s5103_s0 = scalar_lea.hbm %s5889_s15, 256 }
0x1516   :  { %p5104_p7 = scmp.ne.s32.totalorder %s5889_s15, %s5103_s0  ;;  %p5107_p8 = scmp.lt.u32.totalorder %s5103_s0, %s5889_s15 }
0x1518   :  { %p5109_p9 = pnand %p5107_p8, %p5104_p7 }
0x151a   :  { %5112 = shalt.err (!%p5109_p9)
}
0x151b   :  { %4324 = dma.vmem_to_hbm [thread:$0]  %s4319_s26, 256, %s5889_s15, [#allocation4], %s5120_s28, %s5120_s28, %s5121_s29  }
0x151c   :  { %5117 = dma.done.wait [#allocation4], 256  }
0x151d   :  { %5118 = vsyncadd [#allocation4], 4294967040 }
0x151e   :  { %4328 = vsyncpa [#allocation3], 1 }
0x151f   :  { %4329 = vsyncpa [#allocation6], 1 }
0x1520   :  { %4330 = vsyncpa [#allocation4], 1 }

</bundles_post_ra>
